<compile_context>
chip_gen: v6e
topology: v6e:2x2x1
jax: 0.10.0
libtpu: 0.0.40
codegen_flags: <defaults>
</compile_context>

<pallas_src>
import functools

import jax
import jax.numpy as jnp
from jax.experimental import pallas as pl
from jax.experimental.pallas import tpu as pltpu

EPS = 1e-5


def _vmem_limit_bytes():
    # ~3/4 of physical VMEM: ~96 MiB on v5e/v6e (128 MiB), ~48 MiB on v7x (64 MiB).
    try:
        cap = pltpu.get_tpu_info().vmem_capacity_bytes
    except Exception:
        cap = 64 * 1024 * 1024
    return int(min(96 * 1024 * 1024, (cap * 3) // 4))


# -----------------------------------------------------------------------------
# Kernel 1: BN1 (folded scale/bias) -> ReLU -> 1x1 conv, plus per-tile partial
#           BN2 statistics (channel sum / sum-of-squares of the conv1 output).
# -----------------------------------------------------------------------------
def _bn_relu_conv1x1_kernel(x_ref, scale_ref, bias_ref, w_ref, y_ref, stats_ref,
                            *, total_rows, apply_mask):
    # x_ref:      (TR, Cin)  f32  (bf16 cast only for the matmul operand)
    # scale/bias: (1, Cin)   f32  folded BN1
    # w_ref:      (Cin, C4)  bf16
    # y_ref:      (TR, C4)   bf16
    # stats_ref:  (1, 2, C4) f32  -- this tile's [sum(y); sum(y*y)]
    x = x_ref[...]
    a = jnp.maximum(x * scale_ref[...] + bias_ref[...], 0.0)

    if apply_mask:  # static flag: last block reads past the end of the array
        tr = x_ref.shape[0]
        row = (pl.program_id(0) * tr
               + jax.lax.broadcasted_iota(jnp.int32, (tr, 1), 0))
        a = jnp.where(row < total_rows, a, 0.0)

    y = jnp.dot(a.astype(jnp.bfloat16), w_ref[...],
                preferred_element_type=jnp.float32)            # (TR, C4) f32
    yq = y.astype(y_ref.dtype)                                  # bf16 as stored
    y_ref[...] = yq

    # BN2 partial stats from the *stored* (bf16-quantized) values so the
    # normalization in kernel 2 is consistent with its statistics.
    yf = yq.astype(jnp.float32)
    stats_ref[0, 0:1, :] = jnp.sum(yf, axis=0, keepdims=True)
    stats_ref[0, 1:2, :] = jnp.sum(yf * yf, axis=0, keepdims=True)


# -----------------------------------------------------------------------------
# Kernel 2: BN2 -> ReLU -> 3x3 conv (padding=1) -> fused concat([conv_out, x]).
# Tiled over (N, H); 1-row halos come from clamped index_maps; the zero halo of
# the VMEM scratch provides the conv's zero padding *after* the activation.
# -----------------------------------------------------------------------------
def _bn_relu_conv3x3_concat_kernel(y_ref, ytop_ref, ybot_ref, x_ref,
                                   scale_ref, bias_ref, w_ref, out_ref, a_scr):
    # y_ref:      (1, TH, W, C4)    bf16  conv1 output rows of this tile
    # ytop_ref:   (1, 1,  W, C4)    bf16  row above the tile (clamped at top)
    # ybot_ref:   (1, 1,  W, C4)    bf16  row below the tile (clamped at bottom)
    # x_ref:      (1, TH, W, Cin)   f32   original input rows (fused concat)
    # scale/bias: (1, C4)           f32   folded BN2
    # w_ref:      (3, 3*C4, G)      bf16  conv2 weights, w_ref[dy] flattened (dx, c)
    # out_ref:    (1, TH, W, G+Cin) f32
    # a_scr:      (TH+2, W+2, C4)   bf16  zero-halo BN+ReLU'd tile
    i = pl.program_id(1)
    n_h = pl.num_programs(1)
    th, w_dim, c = y_ref.shape[1], y_ref.shape[2], y_ref.shape[3]
    g = w_ref.shape[2]

    scale = scale_ref[...]          # (1, C4)
    bias = bias_ref[...]

    def act(v):                     # BN2 + ReLU in f32, stored as bf16
        return jnp.maximum(v.astype(jnp.float32) * scale + bias,
                           0.0).astype(a_scr.dtype)

    # Zero only the halo that is never overwritten with data:
    # left/right padding columns (corners included) ...
    zeros_col = jnp.zeros((th + 2, 1, c), a_scr.dtype)
    a_scr[:, 0:1, :] = zeros_col
    a_scr[:, w_dim + 1:w_dim + 2, :] = zeros_col

    # ... interior rows are always overwritten ...
    a_scr[1:th + 1, 1:w_dim + 1, :] = act(y_ref[0])

    # ... and the top/bottom halo rows are data from the neighbouring tile or
    # zero at the image boundary (exactly one branch runs per step).
    @pl.when(i > 0)
    def _():
        a_scr[0:1, 1:w_dim + 1, :] = act(ytop_ref[0])

    @pl.when(i == 0)
    def _():
        a_scr[0:1, 1:w_dim + 1, :] = jnp.zeros((1, w_dim, c), a_scr.dtype)

    @pl.when(i < n_h - 1)
    def _():
        a_scr[th + 1:th + 2, 1:w_dim + 1, :] = act(ybot_ref[0])

    @pl.when(i == n_h - 1)
    def _():
        a_scr[th + 1:th + 2, 1:w_dim + 1, :] = jnp.zeros((1, w_dim, c), a_scr.dtype)

    a = a_scr[...]                                              # (TH+2, W+2, C4)

    # im2col, cheap form: 3 dx-shifted copies (sublane axis) lane-concatenated
    # into K = 3*C4; the 3 dy offsets come from the free leading dim and are
    # accumulated with 3 matmuls into an f32 accumulator.
    a3 = jnp.concatenate([a[:, 0:w_dim, :],
                          a[:, 1:w_dim + 1, :],
                          a[:, 2:w_dim + 2, :]], axis=-1)       # (TH+2, W, 3*C4)

    # TODO(synk): for W not a multiple of 8 this reshape forces a sublane
    # relayout; pad W in the scratch (zero columns) to avoid it.
    acc = jnp.zeros((th * w_dim, g), jnp.float32)
    for dy in range(3):             # static unroll
        patches = a3[dy:dy + th].reshape(th * w_dim, 3 * c)
        acc = acc + jnp.dot(patches, w_ref[dy],
                            preferred_element_type=jnp.float32)

    # Fused torch.cat([out, x], dim=1): single lane-dense store of width G+Cin.
    out_ref[0] = jnp.concatenate(
        [acc.reshape(th, w_dim, g), x_ref[0]], axis=-1).astype(out_ref.dtype)


# -----------------------------------------------------------------------------
# Wrapper
# -----------------------------------------------------------------------------
def _round_up(x, m):
    return (x + m - 1) // m * m


def _pick_h_tile(h, target):
    target = min(h, target)
    th = target
    while h % th != 0:
        th -= 1
    if th < min(4, h):      # degenerate divisor (e.g. large prime H): use full H
        th = h
    return th


def bottleneck_forward(x_nchw, params, *, row_tile=2048, h_tile=32):
    gamma1, beta1, w1 = params["gamma1"], params["beta1"], params["w1"]
    gamma2, beta2, w2 = params["gamma2"], params["beta2"], params["w2"]

    N, Cin, H, W = x_nchw.shape
    C4 = w1.shape[1]            # 4 * growth_rate
    G = w2.shape[3]             # growth_rate
    vmem_limit = _vmem_limit_bytes()

    # Single f32 NHWC materialization of x, shared by BN1 stats, kernel 1 and
    # the fused concat in kernel 2.
    x_nhwc = jnp.transpose(x_nchw, (0, 2, 3, 1)).astype(jnp.float32)   # NHWC
    rows = N * H * W
    x2d = x_nhwc.reshape(rows, Cin)                                    # free reshape

    # --- fold BN1 (training-mode batch stats, biased var) into scale/bias ---
    # One fused pass over x: sum and sum-of-squares together.
    # TODO(synk): E[x^2]-E[x]^2 can cancel for extreme inputs; a centered /
    # Welford-style reduction would be more robust.
    s1 = jnp.sum(x2d, axis=0)
    ss1 = jnp.sum(x2d * x2d, axis=0)
    mean1 = s1 / rows
    var1 = jnp.maximum(ss1 / rows - mean1 * mean1, 0.0)
    scale1 = gamma1 / jnp.sqrt(var1 + EPS)
    bias1 = beta1 - mean1 * scale1

    # --- kernel 1: large row tiles, parallel grid, per-tile partial BN2 stats.
    # Ragged tail is handled by Pallas OOB masking of the last block's writes;
    # the in-kernel read mask keeps the BN2 partials correct.
    tile = min(row_tile, _round_up(rows, 8))
    grid1 = pl.cdiv(rows, tile)
    apply_mask = (rows % tile) != 0

    y2d, stats = pl.pallas_call(
        functools.partial(_bn_relu_conv1x1_kernel,
                          total_rows=rows, apply_mask=apply_mask),
        out_shape=(jax.ShapeDtypeStruct((rows, C4), jnp.bfloat16),
                   jax.ShapeDtypeStruct((grid1, 2, C4), jnp.float32)),
        grid=(grid1,),
        in_specs=[
            pl.BlockSpec((tile, Cin), lambda i: (i, 0)),
            pl.BlockSpec((1, Cin), lambda i: (0, 0)),
            pl.BlockSpec((1, Cin), lambda i: (0, 0)),
            pl.BlockSpec((Cin, C4), lambda i: (0, 0)),
        ],
        out_specs=(
            pl.BlockSpec((tile, C4), lambda i: (i, 0)),
            pl.BlockSpec((1, 2, C4), lambda i: (i, 0, 0)),   # per-tile partials
        ),
        compiler_params=pltpu.CompilerParams(
            dimension_semantics=("parallel",),
            vmem_limit_bytes=vmem_limit),
    )(x2d,
      scale1.reshape(1, Cin).astype(jnp.float32),
      bias1.reshape(1, Cin).astype(jnp.float32),
      w1.astype(jnp.bfloat16))

    # --- fold BN2 from the per-tile partial statistics ---
    # TODO(synk): sum/sum-of-squares variance can cancel for very large N*H*W;
    # a Welford-style accumulation would be more robust.
    sums = jnp.sum(stats, axis=0)                    # (2, C4)
    mean2 = sums[0] / rows
    var2 = jnp.maximum(sums[1] / rows - mean2 * mean2, 0.0)
    scale2 = gamma2 / jnp.sqrt(var2 + EPS)
    bias2 = beta2 - mean2 * scale2

    y4d = y2d.reshape(N, H, W, C4)                   # bf16, free reshape

    # --- kernel 2: BN2+ReLU+3x3 conv + fused concat, H-tiled with row halos ---
    th = _pick_h_tile(H, h_tile)
    n_h = H // th

    out = pl.pallas_call(
        _bn_relu_conv3x3_concat_kernel,
        out_shape=jax.ShapeDtypeStruct((N, H, W, G + Cin), jnp.float32),
        grid=(N, n_h),
        in_specs=[
            pl.BlockSpec((1, th, W, C4), lambda n, i: (n, i, 0, 0)),
            pl.BlockSpec((1, 1, W, C4),
                         lambda n, i: (n, jnp.maximum(i * th - 1, 0), 0, 0)),
            pl.BlockSpec((1, 1, W, C4),
                         lambda n, i: (n, jnp.minimum((i + 1) * th, H - 1), 0, 0)),
            pl.BlockSpec((1, th, W, Cin), lambda n, i: (n, i, 0, 0)),
            pl.BlockSpec((1, C4), lambda n, i: (0, 0)),
            pl.BlockSpec((1, C4), lambda n, i: (0, 0)),
            pl.BlockSpec((3, 3 * C4, G), lambda n, i: (0, 0, 0)),
        ],
        out_specs=pl.BlockSpec((1, th, W, G + Cin), lambda n, i: (n, i, 0, 0)),
        scratch_shapes=[pltpu.VMEM((th + 2, W + 2, C4), jnp.bfloat16)],
        compiler_params=pltpu.CompilerParams(
            dimension_semantics=("parallel", "parallel"),
            vmem_limit_bytes=vmem_limit),
    )(y4d, y4d, y4d, x_nhwc,
      scale2.reshape(1, C4).astype(jnp.float32),
      bias2.reshape(1, C4).astype(jnp.float32),
      w2.reshape(3, 3 * C4, G).astype(jnp.bfloat16))

    return jnp.transpose(out, (0, 3, 1, 2))          # back to NCHW


# -----------------------------------------------------------------------------
# Pure-JAX (XLA conv) reference for validation.
# -----------------------------------------------------------------------------
def reference_forward(x_nchw, params):
    gamma1, beta1, w1 = params["gamma1"], params["beta1"], params["w1"]
    gamma2, beta2, w2 = params["gamma2"], params["beta2"], params["w2"]
    N, Cin, H, W = x_nchw.shape
    C4 = w1.shape[1]
    x = jnp.transpose(x_nchw, (0, 2, 3, 1)).astype(jnp.float32)

    mean1 = jnp.mean(x, axis=(0, 1, 2))
    var1 = jnp.mean(jnp.square(x - mean1), axis=(0, 1, 2))
    a1 = jnp.maximum((x - mean1) / jnp.sqrt(var1 + EPS) * gamma1 + beta1, 0.0)
    y = jax.lax.conv_general_dilated(
        a1, w1.reshape(1, 1, Cin, C4), (1, 1), "VALID",
        dimension_numbers=("NHWC", "HWIO", "NHWC"))

    mean2 = jnp.mean(y, axis=(0, 1, 2))
    var2 = jnp.mean(jnp.square(y - mean2), axis=(0, 1, 2))
    a2 = jnp.maximum((y - mean2) / jnp.sqrt(var2 + EPS) * gamma2 + beta2, 0.0)
    o = jax.lax.conv_general_dilated(
        a2, w2, (1, 1), ((1, 1), (1, 1)),
        dimension_numbers=("NHWC", "HWIO", "NHWC"))

    out = jnp.concatenate([o, x], axis=-1)
    return jnp.transpose(out, (0, 3, 1, 2))


if __name__ == "__main__":
    # Small shapes: batch=2, in_planes=8, growth_rate=8, spatial=16x16
    N, Cin, H, W = 2, 8, 16, 16
    growth = 8
    C4 = 4 * growth

    key = jax.random.PRNGKey(0)
    ks = jax.random.split(key, 7)
    x = jax.random.normal(ks[0], (N, Cin, H, W), jnp.float32)

    params = {
        "gamma1": 1.0 + 0.1 * jax.random.normal(ks[1], (Cin,), jnp.float32),
        "beta1": 0.1 * jax.random.normal(ks[2], (Cin,), jnp.float32),
        # conv1.weight (4g, Cin, 1, 1) stored here as (Cin, 4g)  [= w.T squeezed]
        "w1": 0.2 * jax.random.normal(ks[3], (Cin, C4), jnp.float32),
        "gamma2": 1.0 + 0.1 * jax.random.normal(ks[4], (C4,), jnp.float32),
        "beta2": 0.1 * jax.random.normal(ks[5], (C4,), jnp.float32),
        # conv2.weight (g, 4g, 3, 3) stored here as HWIO (3, 3, 4g, g) [= transpose(2,3,1,0)]
        "w2": 0.1 * jax.random.normal(ks[6], (3, 3, C4, growth), jnp.float32),
    }

    out = jax.block_until_ready(bottleneck_forward(x, params))
    ref = jax.block_until_ready(reference_forward(x, params))

    assert out.shape == (N, growth + Cin, H, W), out.shape
    max_err = float(jnp.max(jnp.abs(out - ref)))
    assert max_err < 1e-1, f"mismatch vs reference: {max_err}"
    # TODO(synk): BatchNorm running-stat buffer updates (training side effect)
    # are not modeled; they do not affect the forward output.
    print("KERNEL_OK")
</pallas_src>

<mosaic_0001>
module attributes {stable_mosaic.version = 11 : i64} {
  func.func @_bn_relu_conv1x1_kernel(%arg0: i32, %arg1: memref<512x8xf32, #tpu.memory_space<vmem>>, %arg2: memref<1x8xf32, #tpu.memory_space<vmem>>, %arg3: memref<1x8xf32, #tpu.memory_space<vmem>>, %arg4: memref<8x32xbf16, #tpu.memory_space<vmem>>, %arg5: memref<512x32xbf16, #tpu.memory_space<vmem>>, %arg6: memref<1x2x32xf32, #tpu.memory_space<vmem>>) attributes {dimension_semantics = [#tpu.dimension_semantics<parallel>], iteration_bounds = array<i64: 1>, scalar_prefetch = 0 : i64, scratch_operands = 0 : i64, tpu.core_type = #tpu.core_type<tc>, window_params = [{transform_indices = @transform_0, window_bounds = array<i64: 512, 8>}, {pipeline_mode = #tpu.pipeline_mode<synchronous>, transform_indices = @transform_1, window_bounds = array<i64: 1, 8>}, {pipeline_mode = #tpu.pipeline_mode<synchronous>, transform_indices = @transform_2, window_bounds = array<i64: 1, 8>}, {pipeline_mode = #tpu.pipeline_mode<synchronous>, transform_indices = @transform_3, window_bounds = array<i64: 8, 32>}, {transform_indices = @transform_4, window_bounds = array<i64: 512, 32>}, {transform_indices = @transform_5, window_bounds = array<i64: 1, 2, 32>}]} {
    %c0 = arith.constant 0 : index
    %c0_0 = arith.constant 0 : index
    %0 = vector.load %arg1[%c0, %c0_0] : memref<512x8xf32, #tpu.memory_space<vmem>>, vector<512x8xf32>
    %c0_1 = arith.constant 0 : index
    %c0_2 = arith.constant 0 : index
    %1 = vector.load %arg2[%c0_1, %c0_2] : memref<1x8xf32, #tpu.memory_space<vmem>>, vector<1x8xf32>
    %2 = vector.broadcast %1 : vector<1x8xf32> to vector<512x8xf32>
    %3 = arith.mulf %0, %2 : vector<512x8xf32>
    %c0_3 = arith.constant 0 : index
    %c0_4 = arith.constant 0 : index
    %4 = vector.load %arg3[%c0_3, %c0_4] : memref<1x8xf32, #tpu.memory_space<vmem>>, vector<1x8xf32>
    %5 = vector.broadcast %4 : vector<1x8xf32> to vector<512x8xf32>
    %6 = arith.addf %3, %5 : vector<512x8xf32>
    %cst = arith.constant 0.000000e+00 : f32
    %7 = vector.broadcast %cst : f32 to vector<512x8xf32>
    %8 = arith.maximumf %6, %7 : vector<512x8xf32>
    %9 = arith.truncf %8 : vector<512x8xf32> to vector<512x8xbf16>
    %c0_5 = arith.constant 0 : index
    %c0_6 = arith.constant 0 : index
    %10 = vector.load %arg4[%c0_5, %c0_6] : memref<8x32xbf16, #tpu.memory_space<vmem>>, vector<8x32xbf16>
    %cst_7 = arith.constant dense<0.000000e+00> : vector<512x32xf32>
    %11 = tpu.matmul %9, %10, %cst_7 {dimension_numbers = #tpu.dot_dimension_numbers<[1], [0], [0], [1], [0, 0, 1, 1], [], []>} : vector<512x8xbf16>, vector<8x32xbf16>, vector<512x32xf32> -> vector<512x32xf32>
    %12 = arith.truncf %11 : vector<512x32xf32> to vector<512x32xbf16>
    %c0_8 = arith.constant 0 : index
    %c0_9 = arith.constant 0 : index
    %13 = vector.load %arg5[%c0_8, %c0_9] : memref<512x32xbf16, #tpu.memory_space<vmem>>, vector<512x32xbf16>
    tpu.vector_store %arg5[%c0_8, %c0_9], %12 {strides = array<i32>} : memref<512x32xbf16, #tpu.memory_space<vmem>>, vector<512x32xbf16>,
    %14 = arith.extf %12 : vector<512x32xbf16> to vector<512x32xf32>
    %cst_10 = arith.constant dense<0.000000e+00> : vector<32xf32>
    %15 = vector.multi_reduction <add>, %14, %cst_10 [0] : vector<512x32xf32> to vector<32xf32>
    %16 = vector.shape_cast %15 : vector<32xf32> to vector<1x32xf32>
    %c0_11 = arith.constant 0 : index
    %c0_12 = arith.constant 0 : index
    %c0_13 = arith.constant 0 : index
    %17 = vector.load %arg6[%c0_11, %c0_12, %c0_13] : memref<1x2x32xf32, #tpu.memory_space<vmem>>, vector<1x1x32xf32>
    %18 = vector.shape_cast %17 : vector<1x1x32xf32> to vector<1x32xf32>
    %19 = vector.shape_cast %16 : vector<1x32xf32> to vector<1x1x32xf32>
    tpu.vector_store %arg6[%c0_11, %c0_12, %c0_13], %19 {strides = array<i32>} : memref<1x2x32xf32, #tpu.memory_space<vmem>>, vector<1x1x32xf32>,
    %20 = arith.mulf %14, %14 : vector<512x32xf32>
    %cst_14 = arith.constant dense<0.000000e+00> : vector<32xf32>
    %21 = vector.multi_reduction <add>, %20, %cst_14 [0] : vector<512x32xf32> to vector<32xf32>
    %22 = vector.shape_cast %21 : vector<32xf32> to vector<1x32xf32>
    %c0_15 = arith.constant 0 : index
    %c1 = arith.constant 1 : index
    %c0_16 = arith.constant 0 : index
    %23 = vector.load %arg6[%c0_15, %c1, %c0_16] : memref<1x2x32xf32, #tpu.memory_space<vmem>>, vector<1x1x32xf32>
    %24 = vector.shape_cast %23 : vector<1x1x32xf32> to vector<1x32xf32>
    %25 = vector.shape_cast %22 : vector<1x32xf32> to vector<1x1x32xf32>
    tpu.vector_store %arg6[%c0_15, %c1, %c0_16], %25 {strides = array<i32>} : memref<1x2x32xf32, #tpu.memory_space<vmem>>, vector<1x1x32xf32>,
    return
  }
  func.func @transform_0(%arg0: i32) -> (i32, i32) {
    %c0_i32 = arith.constant 0 : i32
    %c0_i32_0 = arith.constant 0 : i32
    return %arg0, %c0_i32 : i32, i32
  }
  func.func @transform_1(%arg0: i32) -> (i32, i32) {
    %c0_i32 = arith.constant 0 : i32
    %c0_i32_0 = arith.constant 0 : i32
    %c0_i32_1 = arith.constant 0 : i32
    return %c0_i32, %c0_i32_0 : i32, i32
  }
  func.func @transform_2(%arg0: i32) -> (i32, i32) {
    %c0_i32 = arith.constant 0 : i32
    %c0_i32_0 = arith.constant 0 : i32
    %c0_i32_1 = arith.constant 0 : i32
    return %c0_i32, %c0_i32_0 : i32, i32
  }
  func.func @transform_3(%arg0: i32) -> (i32, i32) {
    %c0_i32 = arith.constant 0 : i32
    %c0_i32_0 = arith.constant 0 : i32
    %c0_i32_1 = arith.constant 0 : i32
    return %c0_i32, %c0_i32_0 : i32, i32
  }
  func.func @transform_4(%arg0: i32) -> (i32, i32) {
    %c0_i32 = arith.constant 0 : i32
    %c0_i32_0 = arith.constant 0 : i32
    return %arg0, %c0_i32 : i32, i32
  }
  func.func @transform_5(%arg0: i32) -> (i32, i32, i32) {
    %c0_i32 = arith.constant 0 : i32
    %c0_i32_0 = arith.constant 0 : i32
    %c0_i32_1 = arith.constant 0 : i32
    return %arg0, %c0_i32, %c0_i32_0 : i32, i32, i32
  }
}

</mosaic_0001>

<bundles_post_ra>
// kernel: tpu_custom_call.1
= control target key start
LH: loop header
LB: loop body
LE: loop exit
PB: predicated region body
PF: predicated region fallthrough
CT: control target
= control target key end

     0   :  { %vm421_vm0 = vcmask 1043456   ;;  %vm324_vm1 = vcmask 64512   ;;  %s2730_s0 = inlined_call_operand.vmem [shape: f32[512,8], index: 0, kind: input, shape index: {}]   ;;  %s2731_s1 = inlined_call_operand.vmem [shape: f32[1,8], index: 1, kind: input, shape index: {}]   ;;  %s2732_s2 = inlined_call_operand.vmem [shape: f32[1,8], index: 2, kind: input, shape index: {}]   ;;  %s2733_s3 = inlined_call_operand.vmem [shape: bf16[8,32], index: 3, kind: input, shape index: {}]   ;;  %s2734_s4 = inlined_call_operand.vmem [shape: bf16[512,32], index: 4, kind: output, shape index: {0}]   ;;  %s2735_s5 = inlined_call_operand.hbm [shape: f32[1,2,32], index: 5, kind: output, shape index: {1}]  }
   0x1   :  { %v323_v0 = vld [vmem:[%s2733_s3] sm:$0xf]  ;;  %v22_v2 = vld [vmem:[%s2730_s0 + $0x8] sm:$0xff]  ;;  %v23_v6 = vld [vmem:[%s2730_s0 + $0x10] sm:$0xff] }
   0x2   :  { %v21_v1 = vld [vmem:[%s2730_s0] sm:$0xff]  ;;  %1714 = vmatprep.subr.msk.bf16.mxu0 %vm421_vm0, %v323_v0  ;;  %v423_v3 = vsel %vm421_vm0, %v323_v0, 0  ;;  %1715 = vmatprep.subr.msk.bf16.mxu1 %vm421_vm0, %v323_v0  ;;  %v24_v9 = vld [vmem:[%s2730_s0 + $0x18] sm:$0xff]  ;;  %v26_v12 = vld [vmem:[%s2730_s0 + $0x28] sm:$0xff] }
   0x3   :  { %v1782_v4 = vld [vmem:[%s2731_s1] ss:$0 sm:$0xff]  ;;  %1647 = vmatpush3.bf16.msra.mxu0 %v423_v3  ;;  %1713 = vmatpush3.bf16.msra.mxu1 %v423_v3  ;;  %v27_v16 = vld [vmem:[%s2730_s0 + $0x30] sm:$0xff]  ;;  %v28_v17 = vld [vmem:[%s2730_s0 + $0x38] sm:$0xff] }
   0x4   :  { %v1787_v5 = vld [vmem:[%s2732_s2] ss:$0 sm:$0xff]  ;;  %v92_v7 = vmul.f32 %v1782_v4, %v21_v1  ;;  %v93_v8 = vmul.f32 %v1782_v4, %v22_v2  ;;  %v94_v10 = vmul.f32 %v1782_v4, %v23_v6  ;;  %v95_v13 = vmul.f32 %v1782_v4, %v24_v9  ;;  %v30_v27 = vld [vmem:[%s2730_s0 + $0x48] sm:$0xff]  ;;  %v31_v32 = vld [vmem:[%s2730_s0 + $0x50] sm:$0xff] }
   0x5   :  { %v25_v11 = vld [vmem:[%s2730_s0 + $0x20] sm:$0xff]  ;;  %v97_v15 = vmul.f32 %v1782_v4, %v26_v12  ;;  %v98_v21 = vmul.f32 %v1782_v4, %v27_v16  ;;  %v99_v25 = vmul.f32 %v1782_v4, %v28_v17  ;;  %v32_v37 = vld [vmem:[%s2730_s0 + $0x58] sm:$0xff]  ;;  %v101_v41 = vmul.f32 %v1782_v4, %v30_v27  ;;  %v34_v42 = vld [vmem:[%s2730_s0 + $0x68] sm:$0xff] }
   0x6   :  { %v96_v14 = vmul.f32 %v1782_v4, %v25_v11  ;;  %v163_v18 = vadd.f32 %v1787_v5, %v92_v7  ;;  %v164_v19 = vadd.f32 %v1787_v5, %v93_v8  ;;  %v165_v20 = vadd.f32 %v1787_v5, %v94_v10  ;;  %v29_v26 = vld [vmem:[%s2730_s0 + $0x40] sm:$0xff]  ;;  %v35_v46 = vld [vmem:[%s2730_s0 + $0x70] sm:$0xff]  ;;  %v36_v55 = vld [vmem:[%s2730_s0 + $0x78] sm:$0xff] }
   0x7   :  { %v166_v22 = vadd.f32 %v1787_v5, %v95_v13  ;;  %v168_v24 = vadd.f32 %v1787_v5, %v97_v15  ;;  %v169_v31 = vadd.f32 %v1787_v5, %v98_v21  ;;  %v170_v36 = vadd.f32 %v1787_v5, %v99_v25  ;;  %v33_v38 = vld [vmem:[%s2730_s0 + $0x60] sm:$0xff]  ;;  %v38_v60 = vld [vmem:[%s2730_s0 + $0x88] sm:$0xff]  ;;  %v39_v0 = vld [vmem:[%s2730_s0 + $0x90] sm:$0xff] }
   0x8   :  { %v167_v23 = vadd.f32 %v1787_v5, %v96_v14  ;;  %v227_v28 = vmax.f32 %v163_v18, 0.0  ;;  %v228_v29 = vmax.f32 %v164_v19, 0.0  ;;  %v229_v30 = vmax.f32 %v165_v20, 0.0  ;;  %v37_v56 = vld [vmem:[%s2730_s0 + $0x80] sm:$0xff]  ;;  %v40_v1 = vld [vmem:[%s2730_s0 + $0x98] sm:$0xff]  ;;  %v42_v10 = vld [vmem:[%s2730_s0 + $0xa8] sm:$0xff] }
   0x9   :  { %v230_v33 = vmax.f32 %v166_v22, 0.0  ;;  %v232_v35 = vmax.f32 %v168_v24, 0.0  ;;  %v100_v40 = vmul.f32 %v1782_v4, %v29_v26  ;;  %v102_v45 = vmul.f32 %v1782_v4, %v31_v32  ;;  %v41_v6 = vld [vmem:[%s2730_s0 + $0xa0] sm:$0xff]  ;;  %v43_v15 = vld [vmem:[%s2730_s0 + $0xb0] sm:$0xff]  ;;  %v44_v20 = vld [vmem:[%s2730_s0 + $0xb8] sm:$0xff] }
   0xa   :  { %v231_v34 = vmax.f32 %v167_v23, 0.0  ;;  %v291_v39 = vpack.c.bf16 %v228_v29, %v227_v28  ;;  %v172_v48 = vadd.f32 %v1787_v5, %v101_v41  ;;  %v103_v49 = vmul.f32 %v1782_v4, %v32_v37  ;;  %v45_v25 = vld [vmem:[%s2730_s0 + $0xc0] sm:$0xff]  ;;  %v46_v29 = vld [vmem:[%s2730_s0 + $0xc8] sm:$0xff] }
   0xb   :  { %v292_v43 = vpack.c.bf16 %v230_v33, %v229_v30  ;;  %v171_v47 = vadd.f32 %v1787_v5, %v100_v40  ;;  %v104_v50 = vmul.f32 %v1782_v4, %v33_v38  ;;  %v233_v51 = vmax.f32 %v169_v31, 0.0  ;;  %v47_v33 = vld [vmem:[%s2730_s0 + $0xd0] sm:$0xff] }
   0xc   :  { %v293_v44 = vpack.c.bf16 %v232_v35, %v231_v34  ;;  %1648 = vmatprep.mubr.msk.bf16.mxu0 %vm324_vm1, %v291_v39  ;;  %v234_v52 = vmax.f32 %v170_v36, 0.0  ;;  %v173_v53 = vadd.f32 %v1787_v5, %v102_v45  ;;  %v105_v54 = vmul.f32 %v1782_v4, %v34_v42  ;;  %v48_v42 = vld [vmem:[%s2730_s0 + $0xd8] sm:$0xff] }
   0xd   :  { %1649 = vmatmul.mubr.msk.bf16.vlgmr.msra.gmra.mxu0 %vm324_vm1, %v292_v43  ;;  %v235_v57 = vmax.f32 %v171_v47, 0.0  ;;  %v236_v58 = vmax.f32 %v172_v48, 0.0  ;;  %v106_v59 = vmul.f32 %v1782_v4, %v35_v46  ;;  %v174_v61 = vadd.f32 %v1787_v5, %v103_v49 }
   0xe   :  { %1652 = vmatprep.mubr.msk.bf16.mxu0 %vm324_vm1, %v293_v44  ;;  %v175_v62 = vadd.f32 %v1787_v5, %v104_v50  ;;  %v176_v63 = vadd.f32 %v1787_v5, %v105_v54  ;;  %v107_v2 = vmul.f32 %v1782_v4, %v36_v55  ;;  %v108_v3 = vmul.f32 %v1782_v4, %v37_v56 }
   0xf   :  { %v294_v7 = vpack.c.bf16 %v234_v52, %v233_v51  ;;  %v237_v8 = vmax.f32 %v173_v53, 0.0  ;;  %v109_v9 = vmul.f32 %v1782_v4, %v38_v60  ;;  %v295_v11 = vpack.c.bf16 %v236_v58, %v235_v57 }
  0x10   :  { %v177_v12 = vadd.f32 %v1787_v5, %v106_v59  ;;  %v110_v13 = vmul.f32 %v1782_v4, %v39_v0  ;;  %v111_v14 = vmul.f32 %v1782_v4, %v40_v1  ;;  %v238_v16 = vmax.f32 %v174_v61, 0.0 }
  0x11   :  { %v239_v17 = vmax.f32 %v175_v62, 0.0  ;;  %v240_v18 = vmax.f32 %v176_v63, 0.0  ;;  %v112_v19 = vmul.f32 %v1782_v4, %v41_v6  ;;  %v178_v21 = vadd.f32 %v1787_v5, %v107_v2 }
  0x12   :  { %v179_v22 = vadd.f32 %v1787_v5, %v108_v3  ;;  %v180_v23 = vadd.f32 %v1787_v5, %v109_v9  ;;  %v113_v24 = vmul.f32 %v1782_v4, %v42_v10  ;;  %v181_v26 = vadd.f32 %v1787_v5, %v110_v13 }
  0x13   :  { %v182_v27 = vadd.f32 %v1787_v5, %v111_v14  ;;  %v114_v28 = vmul.f32 %v1782_v4, %v43_v15  ;;  %v183_v30 = vadd.f32 %v1787_v5, %v112_v19  ;;  %v115_v32 = vmul.f32 %v1782_v4, %v44_v20 }
  0x14   :  { %v184_v31 = vadd.f32 %v1787_v5, %v113_v24  ;;  %v296_v34 = vpack.c.bf16 %v238_v16, %v237_v8  ;;  %v297_v35 = vpack.c.bf16 %v240_v18, %v239_v17  ;;  %v241_v36 = vmax.f32 %v177_v12, 0.0 }
  0x15   :  { %1653 = vmatmul.mubr.msk.bf16.gmra.mxu0 %vm324_vm1, %v294_v7  ;;  %v116_v37 = vmul.f32 %v1782_v4, %v45_v25  ;;  %v242_v38 = vmax.f32 %v178_v21, 0.0  ;;  %v243_v39 = vmax.f32 %v179_v22, 0.0  ;;  %v244_v40 = vmax.f32 %v180_v23, 0.0 }
  0x16   :  { %1656 = vmatprep.mubr.msk.bf16.mxu0 %vm324_vm1, %v295_v11  ;;  %v117_v41 = vmul.f32 %v1782_v4, %v46_v29 }
  0x17   :  { %11 = vsyncpa [#allocation3], 0  ;;  %v245_v43 = vmax.f32 %v181_v26, 0.0  ;;  %v246_v44 = vmax.f32 %v182_v27, 0.0  ;;  %v1921_v45 = vadd.f32 %v1787_v5, %v114_v28  ;;  %v118_v46 = vmul.f32 %v1782_v4, %v47_v33  ;;  %v49_v47 = vld [vmem:[%s2730_s0 + $0xe0] sm:$0xff]  ;;  %v50_v56 = vld [vmem:[%s2730_s0 + $0xe8] sm:$0xff] }
  0x18   :  { %v247_v48 = vmax.f32 %v183_v30, 0.0  ;;  %v248_v49 = vmax.f32 %v184_v31, 0.0  ;;  %v1928_v50 = vadd.f32 %v1787_v5, %v115_v32  ;;  %v1931_v51 = vadd.f32 %v1787_v5, %v116_v37  ;;  %v53_v54 = vld [vmem:[%s2730_s0 + $0x100] sm:$0xff]  ;;  %v54_v58 = vld [vmem:[%s2730_s0 + $0x108] sm:$0xff]  ;;  %v55_v63 = vld [vmem:[%s2730_s0 + $0x110] sm:$0xff] }
  0x19   :  { %v1934_v52 = vadd.f32 %v1787_v5, %v117_v41  ;;  %v119_v53 = vmul.f32 %v1782_v4, %v48_v42  ;;  %v298_v55 = vpack.c.bf16 %v242_v38, %v241_v36  ;;  %v120_v57 = vmul.f32 %v1782_v4, %v49_v47  ;;  %v56_v0 = vld [vmem:[%s2730_s0 + $0x118] sm:$0xff]  ;;  %v51_v6 = vld [vmem:[%s2730_s0 + $0xf0] sm:$0xff]  ;;  %v57_v8 = vld [vmem:[%s2730_s0 + $0x120] sm:$0xff] }
  0x1a   :  { %v299_v59 = vpack.c.bf16 %v244_v40, %v243_v39  ;;  %v1948_v60 = vpack.c.bf16 %v246_v44, %v245_v43  ;;  %v249_v61 = vmax.f32 %v1921_v45, 0.0  ;;  %v1952_v62 = vadd.f32 %v1787_v5, %v118_v46  ;;  %v58_v13 = vld [vmem:[%s2730_s0 + $0x128] sm:$0xff]  ;;  %v59_v18 = vld [vmem:[%s2730_s0 + $0x130] sm:$0xff]  ;;  %v60_v23 = vld [vmem:[%s2730_s0 + $0x138] sm:$0xff] }
  0x1b   :  { %v1961_v1 = vpack.c.bf16 %v248_v49, %v247_v48  ;;  %v250_v2 = vmax.f32 %v1928_v50, 0.0  ;;  %v251_v3 = vmax.f32 %v1931_v51, 0.0  ;;  %v124_v7 = vmul.f32 %v1782_v4, %v53_v54  ;;  %v61_v28 = vld [vmem:[%s2730_s0 + $0x140] sm:$0xff]  ;;  %v62_v33 = vld [vmem:[%s2730_s0 + $0x148] sm:$0xff]  ;;  %v63_v38 = vld [vmem:[%s2730_s0 + $0x150] sm:$0xff] }
  0x1c   :  { %v252_v9 = vmax.f32 %v1934_v52, 0.0  ;;  %v1974_v10 = vadd.f32 %v1787_v5, %v119_v53  ;;  %v121_v11 = vmul.f32 %v1782_v4, %v50_v56  ;;  %v125_v12 = vmul.f32 %v1782_v4, %v54_v58  ;;  %v64_v39 = vld [vmem:[%s2730_s0 + $0x158] sm:$0xff]  ;;  %v65_v44 = vld [vmem:[%s2730_s0 + $0x160] sm:$0xff]  ;;  %v66_v53 = vld [vmem:[%s2730_s0 + $0x168] sm:$0xff] }
  0x1d   :  { %1657 = vmatmul.mubr.msk.bf16.gmra.mxu0 %vm324_vm1, %v296_v34  ;;  %v1982_v14 = vadd.f32 %v1787_v5, %v120_v57  ;;  %v195_v15 = vadd.f32 %v1787_v5, %v124_v7  ;;  %v126_v16 = vmul.f32 %v1782_v4, %v55_v63  ;;  %v127_v17 = vmul.f32 %v1782_v4, %v56_v0  ;;  %v67_v58 = vld [vmem:[%s2730_s0 + $0x170] sm:$0xff]  ;;  %v76_v45 = vld [vmem:[%s2730_s0 + $0x1b8] sm:$0xff] }
  0x1e   :  { %1660 = vmatprep.mubr.msk.bf16.mxu0 %vm324_vm1, %v297_v35  ;;  %v253_v19 = vmax.f32 %v1952_v62, 0.0  ;;  %v122_v20 = vmul.f32 %v1782_v4, %v51_v6  ;;  %v196_v21 = vadd.f32 %v1787_v5, %v125_v12  ;;  %v128_v22 = vmul.f32 %v1782_v4, %v57_v8  ;;  %v68_v8 = vld [vmem:[%s2730_s0 + $0x178] sm:$0xff]  ;;  %v73_v62 = vld [vmem:[%s2730_s0 + $0x1a0] sm:$0xff] }
  0x1f   :  { %v259_v24 = vmax.f32 %v195_v15, 0.0  ;;  %v197_v25 = vadd.f32 %v1787_v5, %v126_v16  ;;  %v198_v26 = vadd.f32 %v1787_v5, %v127_v17  ;;  %v129_v27 = vmul.f32 %v1782_v4, %v58_v13  ;;  %v69_v16 = vld [vmem:[%s2730_s0 + $0x180] sm:$0xff] }
  0x20   :  { %v2004_v29 = vadd.f32 %v1787_v5, %v121_v11  ;;  %v260_v30 = vmax.f32 %v196_v21, 0.0  ;;  %v199_v31 = vadd.f32 %v1787_v5, %v128_v22  ;;  %v130_v32 = vmul.f32 %v1782_v4, %v59_v18 }
  0x21   :  { %v261_v34 = vmax.f32 %v197_v25, 0.0  ;;  %v262_v35 = vmax.f32 %v198_v26, 0.0  ;;  %v200_v36 = vadd.f32 %v1787_v5, %v129_v27  ;;  %v131_v37 = vmul.f32 %v1782_v4, %v60_v23  ;;  %v70_v27 = vld [vmem:[%s2730_s0 + $0x188] sm:$0xff] }
  0x22   :  { %v307_v40 = vpack.c.bf16 %v260_v30, %v259_v24  ;;  %v263_v41 = vmax.f32 %v199_v31, 0.0  ;;  %v201_v42 = vadd.f32 %v1787_v5, %v130_v32  ;;  %v132_v43 = vmul.f32 %v1782_v4, %v61_v28 }
  0x23   :  { %v308_v46 = vpack.c.bf16 %v262_v35, %v261_v34  ;;  %v264_v47 = vmax.f32 %v200_v36, 0.0  ;;  %v202_v48 = vadd.f32 %v1787_v5, %v131_v37  ;;  %v133_v49 = vmul.f32 %v1782_v4, %v62_v33  ;;  %v71_v36 = vld [vmem:[%s2730_s0 + $0x190] sm:$0xff] }
  0x24   :  { %1680 = vmatprep.mubr.msk.bf16.mxu1 %vm324_vm1, %v307_v40  ;;  %v265_v54 = vmax.f32 %v201_v42, 0.0  ;;  %v134_v56 = vmul.f32 %v1782_v4, %v63_v38  ;;  %v135_v57 = vmul.f32 %v1782_v4, %v64_v39  ;;  %v136_v7 = vmul.f32 %v1782_v4, %v65_v44  ;;  %v72_v40 = vld [vmem:[%s2730_s0 + $0x198] sm:$0xff] }
  0x25   :  { %1661 = vmatmul.mubr.msk.bf16.gmra.mxu0 %vm324_vm1, %v298_v55  ;;  %v203_v55 = vadd.f32 %v1787_v5, %v132_v43  ;;  %1681 = vmatmul.mubr.msk.bf16.vlgmr.msra.gmra.mxu1 %vm324_vm1, %v308_v46  ;;  %v309_v63 = vpack.c.bf16 %v264_v47, %v263_v41  ;;  %v266_v0 = vmax.f32 %v202_v48, 0.0  ;;  %v204_v6 = vadd.f32 %v1787_v5, %v133_v49  ;;  %v74_v41 = vld [vmem:[%s2730_s0 + $0x1a8] sm:$0xff]  ;;  %v79_v49 = vld [vmem:[%s2730_s0 + $0x1d0] sm:$0xff] }
  0x26   :  { %1664 = vmatprep.mubr.msk.bf16.mxu0 %vm324_vm1, %v299_v59  ;;  %v52_v59 = vld [vmem:[%s2730_s0 + $0xf8] sm:$0xff]  ;;  %v205_v12 = vadd.f32 %v1787_v5, %v134_v56  ;;  %v206_v13 = vadd.f32 %v1787_v5, %v135_v57  ;;  %v137_v15 = vmul.f32 %v1782_v4, %v66_v53  ;;  %v254_v17 = vmax.f32 %v1974_v10, 0.0  ;;  %v78_v43 = vld [vmem:[%s2730_s0 + $0x1c8] sm:$0xff] }
  0x27   :  { %v267_v11 = vmax.f32 %v203_v55, 0.0  ;;  %1684 = vmatprep.mubr.msk.bf16.mxu1 %vm324_vm1, %v309_v63  ;;  %v268_v18 = vmax.f32 %v204_v6, 0.0  ;;  %v207_v21 = vadd.f32 %v1787_v5, %v136_v7  ;;  %v138_v22 = vmul.f32 %v1782_v4, %v67_v58  ;;  %v80_v53 = vld [vmem:[%s2730_s0 + $0x1d8] sm:$0xff]  ;;  %v81_v58 = vld [vmem:[%s2730_s0 + $0x1e0] sm:$0xff]  ;;  %v82_v7 = vld [vmem:[%s2730_s0 + $0x1e8] sm:$0xff] }
  0x28   :  { %v255_v23 = vmax.f32 %v1982_v14, 0.0  ;;  %v123_v24 = vmul.f32 %v1782_v4, %v52_v59  ;;  %v208_v25 = vadd.f32 %v1787_v5, %v137_v15  ;;  %v139_v26 = vmul.f32 %v1782_v4, %v68_v8  ;;  %v83_v15 = vld [vmem:[%s2730_s0 + $0x1f0] sm:$0xff] }
  0x29   :  { %v256_v10 = vmax.f32 %v2004_v29, 0.0  ;;  %v2066_v28 = vadd.f32 %v1787_v5, %v122_v20  ;;  %v310_v30 = vpack.c.bf16 %v266_v0, %v265_v54  ;;  %v140_v31 = vmul.f32 %v1782_v4, %v69_v16 }
  0x2a   :  { %v311_v14 = vpack.c.bf16 %v268_v18, %v267_v11  ;;  %v269_v32 = vmax.f32 %v205_v12, 0.0  ;;  %v270_v33 = vmax.f32 %v206_v13, 0.0  ;;  %v2072_v34 = vadd.f32 %v1787_v5, %v138_v22  ;;  %v84_v22 = vld [vmem:[%s2730_s0 + $0x1f8] sm:$0xff] }
  0x2b   :  { %v271_v35 = vmax.f32 %v207_v21, 0.0  ;;  %v272_v29 = vmax.f32 %v208_v25, 0.0  ;;  %v141_v20 = vmul.f32 %v1782_v4, %v70_v27  ;;  %v302_v37 = vpack.c.bf16 %v250_v2, %v249_v61  ;;  %v77_v2 = vld [vmem:[%s2730_s0 + $0x1c0] sm:$0xff] }
  0x2c   :  { %v2093_v38 = vpack.c.bf16 %v254_v17, %v253_v19  ;;  %v2096_v39 = vadd.f32 %v1787_v5, %v139_v26  ;;  %v2104_v50 = vpack.c.bf16 %v256_v10, %v255_v23  ;;  %v2107_v51 = vadd.f32 %v1787_v5, %v123_v24 }
  0x2d   :  { %1665 = vmatmul.mubr.msk.bf16.gmra.mxu0 %vm324_vm1, %v1948_v60  ;;  %v75_v60 = vld [vmem:[%s2730_s0 + $0x1b0] sm:$0xff]  ;;  %v257_v52 = vmax.f32 %v2066_v28, 0.0  ;;  %1685 = vmatmul.mubr.msk.bf16.gmra.mxu1 %vm324_vm1, %v310_v30  ;;  %v2112_v61 = vadd.f32 %v1787_v5, %v140_v31  ;;  %v142_v19 = vmul.f32 %v1782_v4, %v71_v36  ;;  %v313_v44 = vpack.c.bf16 %v272_v29, %v271_v35 }
  0x2e   :  { %1668 = vmatprep.mubr.msk.bf16.mxu0 %vm324_vm1, %v1961_v1  ;;  %v303_v1 = vpack.c.bf16 %v252_v9, %v251_v3  ;;  %1688 = vmatprep.mubr.msk.bf16.mxu1 %vm324_vm1, %v311_v14  ;;  %v312_v3 = vpack.c.bf16 %v270_v33, %v269_v32  ;;  %v273_v9 = vmax.f32 %v2072_v34, 0.0  ;;  %v146_v42 = vmul.f32 %v1782_v4, %v75_v60 }
  0x2f   :  { %v212_v46 = vadd.f32 %v1787_v5, %v141_v20  ;;  %v143_v47 = vmul.f32 %v1782_v4, %v72_v40  ;;  %v147_v48 = vmul.f32 %v1782_v4, %v76_v45  ;;  %v274_v54 = vmax.f32 %v2096_v39, 0.0 }
  0x30   :  { %v144_v55 = vmul.f32 %v1782_v4, %v73_v62  ;;  %v217_v56 = vadd.f32 %v1787_v5, %v146_v42  ;;  %v148_v57 = vmul.f32 %v1782_v4, %v77_v2  ;;  %v275_v59 = vmax.f32 %v2112_v61, 0.0 }
  0x31   :  { %v145_v63 = vmul.f32 %v1782_v4, %v74_v41  ;;  %v218_v0 = vadd.f32 %v1787_v5, %v147_v48  ;;  %v149_v6 = vmul.f32 %v1782_v4, %v78_v43  ;;  %v150_v12 = vmul.f32 %v1782_v4, %v79_v49 }
  0x32   :  { %v281_v8 = vmax.f32 %v217_v56, 0.0  ;;  %v219_v11 = vadd.f32 %v1787_v5, %v148_v57  ;;  %v151_v13 = vmul.f32 %v1782_v4, %v80_v53  ;;  %v276_v16 = vmax.f32 %v212_v46, 0.0 }
  0x33   :  { %v282_v17 = vmax.f32 %v218_v0, 0.0  ;;  %v220_v18 = vadd.f32 %v1787_v5, %v149_v6  ;;  %v152_v21 = vmul.f32 %v1782_v4, %v81_v58  ;;  %v221_v24 = vadd.f32 %v1787_v5, %v150_v12 }
  0x34   :  { %v283_v23 = vmax.f32 %v219_v11, 0.0  ;;  %v222_v25 = vadd.f32 %v1787_v5, %v151_v13  ;;  %v153_v26 = vmul.f32 %v1782_v4, %v82_v7  ;;  %v154_v31 = vmul.f32 %v1782_v4, %v83_v15 }
  0x35   :  { %1669 = vmatmul.mubr.msk.bf16.gmra.mxu0 %vm324_vm1, %v302_v37  ;;  %1689 = vmatmul.mubr.msk.bf16.gmra.mxu1 %vm324_vm1, %v312_v3  ;;  %v318_v27 = vpack.c.bf16 %v282_v17, %v281_v8  ;;  %v284_v10 = vmax.f32 %v220_v18, 0.0  ;;  %v223_v30 = vadd.f32 %v1787_v5, %v152_v21  ;;  %v285_v14 = vmax.f32 %v221_v24, 0.0 }
  0x36   :  { %1672 = vmatprep.mubr.msk.bf16.mxu0 %vm324_vm1, %v303_v1  ;;  %1692 = vmatprep.mubr.msk.bf16.mxu1 %vm324_vm1, %v313_v44  ;;  %v286_v32 = vmax.f32 %v222_v25, 0.0  ;;  %v224_v33 = vadd.f32 %v1787_v5, %v153_v26  ;;  %v155_v34 = vmul.f32 %v1782_v4, %v84_v22  ;;  %v258_v35 = vmax.f32 %v2107_v51, 0.0 }
  0x37   :  { %v319_v29 = vpack.c.bf16 %v284_v10, %v283_v23  ;;  %v287_v20 = vmax.f32 %v223_v30, 0.0  ;;  %v225_v36 = vadd.f32 %v1787_v5, %v154_v31  ;;  %v213_v60 = vadd.f32 %v1787_v5, %v142_v19 }
  0x38   :  { %v320_v37 = vpack.c.bf16 %v286_v32, %v285_v14  ;;  %v288_v1 = vmax.f32 %v224_v33, 0.0  ;;  %v226_v39 = vadd.f32 %v1787_v5, %v155_v34  ;;  %v314_v40 = vpack.c.bf16 %v274_v54, %v273_v9 }
  0x39   :  { %v214_v45 = vadd.f32 %v1787_v5, %v143_v47  ;;  %v215_v61 = vadd.f32 %v1787_v5, %v144_v55  ;;  %v289_v62 = vmax.f32 %v225_v36, 0.0  ;;  %v315_v4 = vpack.c.bf16 %v276_v16, %v275_v59 }
  0x3a   :  { %v216_v51 = vadd.f32 %v1787_v5, %v145_v63  ;;  %v321_v2 = vpack.c.bf16 %v288_v1, %v287_v20  ;;  %v290_v3 = vmax.f32 %v226_v39, 0.0  ;;  %v277_v9 = vmax.f32 %v213_v60, 0.0 }
  0x3b   :  { %v278_v41 = vmax.f32 %v214_v45, 0.0  ;;  %v306_v42 = vpack.c.bf16 %v258_v35, %v257_v52  ;;  %v279_v43 = vmax.f32 %v215_v61, 0.0  ;;  %vm970_vm2 = vcmask 257024  }
  0x3c   :  { %v322_v19 = vpack.c.bf16 %v290_v3, %v289_v62  ;;  %vm1099_vm3 = vcmask 261120   ;;  %vm1233_vm4 = vcmask 253952  }
  0x3d   :  { %1673 = vmatmul.mubr.msk.bf16.gmra.mxu0 %vm324_vm1, %v2093_v38  ;;  %1693 = vmatmul.mubr.msk.bf16.gmra.mxu1 %vm324_vm1, %v314_v40  ;;  %v280_v38 = vmax.f32 %v216_v51, 0.0  ;;  %v316_v44 = vpack.c.bf16 %v278_v41, %v277_v9 }
  0x3e   :  { %1676 = vmatprep.mubr.msk.bf16.mxu0 %vm324_vm1, %v2104_v50  ;;  %1696 = vmatprep.mubr.msk.bf16.mxu1 %vm324_vm1, %v315_v4 }
  0x3f   :  { %v317_v5 = vpack.c.bf16 %v280_v38, %v279_v43 }
  0x45   :  { %1677 = vmatmul.mubr.msk.bf16.gmra.mxu0 %vm324_vm1, %v306_v42  ;;  %1697 = vmatmul.mubr.msk.bf16.gmra.mxu1 %vm324_vm1, %v316_v44 }
  0x46   :  { %1700 = vmatprep.mubr.msk.bf16.mxu1 %vm324_vm1, %v317_v5 }
  0x4d   :  { %1701 = vmatmul.mubr.msk.bf16.gmra.mxu1 %vm324_vm1, %v318_v27 }
  0x4e   :  { %1704 = vmatprep.mubr.msk.bf16.mxu1 %vm324_vm1, %v319_v29 }
  0x55   :  { %1705 = vmatmul.mubr.msk.bf16.gmra.mxu1 %vm324_vm1, %v320_v37 }
  0x56   :  { %1708 = vmatprep.mubr.msk.bf16.mxu1 %vm324_vm1, %v321_v2 }
  0x5d   :  { %1709 = vmatmul.mubr.msk.bf16.gmra.mxu1 %vm324_vm1, %v322_v19 }
  0xcd   :  { %v1650_v28 = vpop.f32.mrf.mxu0 }
  0xce   :  { %v1551_v50 = vpack.c.bf16 %v1650_v28, %v1650_v28 }
  0xcf   :  { %v459_v52 = vpop.f32.mrf.mxu0 }
  0xd0   :  { %973 = vst.msk [vmem:[%s2734_s4 + $0x8] sm:$0xf] %vm970_vm2, %v1551_v50  ;;  %v1549_v46 = vpack.c.bf16 %v459_v52, %v459_v52 }
  0xd1   :  { %v1651_v47 = vpop.f32.mrf.mxu0 }
  0xd2   :  { %971 = vst.msk [vmem:[%s2734_s4] sm:$0xf] %vm970_vm2, %v1549_v46  ;;  %v715_v48 = vpack.c.bf16 %v1651_v47, %v1650_v28  ;;  %v1552_v49 = vpack.c.bf16 %v1651_v47, %v1651_v47 }
  0xd3   :  { %v462_v53 = vpop.f32.mrf.mxu0 }
  0xd4   :  { %974 = vst.msk [vmem:[%s2734_s4 + $0xc] sm:$0xf] %vm970_vm2, %v1552_v49  ;;  %v1037_v54 = vunpack.c.l.bf16 %v715_v48  ;;  %v714_v55 = vpack.c.bf16 %v462_v53, %v459_v52  ;;  %v1550_v56 = vpack.c.bf16 %v462_v53, %v462_v53  ;;  %v1038_v6 = vunpack.c.h.bf16 %v715_v48 }
  0xd5   :  { %v1654_v57 = vpop.f32.mrf.mxu0 }
  0xd6   :  { %972 = vst.msk [vmem:[%s2734_s4 + $0x4] sm:$0xf] %vm970_vm2, %v1550_v56  ;;  %v1035_v58 = vunpack.c.l.bf16 %v714_v55  ;;  %v1036_v59 = vunpack.c.h.bf16 %v714_v55  ;;  %v1555_v63 = vpack.c.bf16 %v1654_v57, %v1654_v57  ;;  %v1237_v7 = vmul.f32 %v1037_v54, %v1037_v54 }
  0xd7   :  { %v475_v0 = vpop.f32.mrf.mxu0  ;;  %v1103_v22 = vsel %vm1099_vm3, %v1037_v54, 0.0  ;;  %v1238_v26 = vmul.f32 %v1038_v6, %v1038_v6  ;;  %v1105_v35 = vsel %vm1099_vm3, %v1038_v6, 0.0 }
  0xd8   :  { %v1553_v8 = vpack.c.bf16 %v475_v0, %v475_v0  ;;  %v1100_v11 = vsel %vm1099_vm3, %v1035_v58, 0.0  ;;  %v1101_v12 = vsel %vm1099_vm3, %v1036_v59, 0.0  ;;  %v1235_v13 = vmul.f32 %v1035_v58, %v1035_v58  ;;  %977 = vst.msk [vmem:[%s2734_s4 + $0x18] sm:$0xf] %vm970_vm2, %v1555_v63 }
  0xd9   :  { %v1236_v15 = vmul.f32 %v1036_v59, %v1036_v59  ;;  %v1655_v16 = vpop.f32.mrf.mxu0  ;;  %v1102_v17 = vadd.f32 %v1101_v12, %v1100_v11  ;;  %v1302_v30 = vsel %vm1099_vm3, %v1237_v7, 0.0  ;;  %v1304_v37 = vsel %vm1099_vm3, %v1238_v26, 0.0 }
  0xda   :  { %975 = vst.msk [vmem:[%s2734_s4 + $0x10] sm:$0xf] %vm970_vm2, %v1553_v8  ;;  %v717_v18 = vpack.c.bf16 %v1655_v16, %v1654_v57  ;;  %v1556_v21 = vpack.c.bf16 %v1655_v16, %v1655_v16  ;;  %v1299_v23 = vsel %vm1099_vm3, %v1235_v13, 0.0 }
  0xdb   :  { %v1300_v24 = vsel %vm1099_vm3, %v1236_v15, 0.0  ;;  %v478_v25 = vpop.f32.mrf.mxu0  ;;  %v1104_v27 = vadd.f32 %v1103_v22, %v1102_v17 }
  0xdc   :  { %v1301_v10 = vadd.f32 %v1300_v24, %v1299_v23  ;;  %978 = vst.msk [vmem:[%s2734_s4 + $0x1c] sm:$0xf] %vm970_vm2, %v1556_v21  ;;  %v1041_v31 = vunpack.c.l.bf16 %v717_v18  ;;  %v716_v14 = vpack.c.bf16 %v478_v25, %v475_v0  ;;  %v1554_v32 = vpack.c.bf16 %v478_v25, %v478_v25 }
  0xdd   :  { %v1658_v33 = vpop.f32.mrf.mxu0  ;;  %v1042_v29 = vunpack.c.h.bf16 %v717_v18  ;;  %v1106_v1 = vadd.f32 %v1105_v35, %v1104_v27 }
  0xde   :  { %v1303_v34 = vadd.f32 %v1302_v30, %v1301_v10  ;;  %976 = vst.msk [vmem:[%s2734_s4 + $0x14] sm:$0xf] %vm970_vm2, %v1554_v32  ;;  %v1039_v20 = vunpack.c.l.bf16 %v716_v14  ;;  %v1040_v36 = vunpack.c.h.bf16 %v716_v14  ;;  %v1559_v39 = vpack.c.bf16 %v1658_v33, %v1658_v33 }
  0xdf   :  { %v491_v60 = vpop.f32.mrf.mxu0  ;;  %v1241_v45 = vmul.f32 %v1041_v31, %v1041_v31  ;;  %v1242_v41 = vmul.f32 %v1042_v29, %v1042_v29  ;;  %v1111_v44 = vsel %vm1099_vm3, %v1041_v31, 0.0  ;;  %v1113_v53 = vsel %vm1099_vm3, %v1042_v29, 0.0 }
  0xe0   :  { %v1557_v40 = vpack.c.bf16 %v491_v60, %v491_v60  ;;  %v1107_v61 = vsel %vm1099_vm3, %v1039_v20, 0.0  ;;  %v1239_v62 = vmul.f32 %v1039_v20, %v1039_v20  ;;  %v1305_v4 = vadd.f32 %v1304_v37, %v1303_v34  ;;  %981 = vst.msk [vmem:[%s2734_s4 + $0x28] sm:$0xf] %vm970_vm2, %v1559_v39 }
  0xe1   :  { %v1659_v51 = vpop.f32.mrf.mxu0  ;;  %v1108_v2 = vadd.f32 %v1107_v61, %v1106_v1  ;;  %v1240_v3 = vmul.f32 %v1040_v36, %v1040_v36  ;;  %v1109_v42 = vsel %vm1099_vm3, %v1040_v36, 0.0  ;;  %v1310_v54 = vsel %vm1099_vm3, %v1241_v45, 0.0 }
  0xe2   :  { %979 = vst.msk [vmem:[%s2734_s4 + $0x20] sm:$0xf] %vm970_vm2, %v1557_v40  ;;  %v719_v19 = vpack.c.bf16 %v1659_v51, %v1658_v33  ;;  %v1560_v9 = vpack.c.bf16 %v1659_v51, %v1659_v51  ;;  %v1306_v43 = vsel %vm1099_vm3, %v1239_v62, 0.0  ;;  %v1312_v57 = vsel %vm1099_vm3, %v1242_v41, 0.0 }
  0xe3   :  { %v494_v38 = vpop.f32.mrf.mxu0  ;;  %v1110_v5 = vadd.f32 %v1109_v42, %v1108_v2  ;;  %v1307_v28 = vadd.f32 %v1306_v43, %v1305_v4  ;;  %v1308_v52 = vsel %vm1099_vm3, %v1240_v3, 0.0 }
  0xe4   :  { %982 = vst.msk [vmem:[%s2734_s4 + $0x2c] sm:$0xf] %vm970_vm2, %v1560_v9  ;;  %v1045_v50 = vunpack.c.l.bf16 %v719_v19  ;;  %v1046_v46 = vunpack.c.h.bf16 %v719_v19  ;;  %v718_v47 = vpack.c.bf16 %v494_v38, %v491_v60  ;;  %v1558_v48 = vpack.c.bf16 %v494_v38, %v494_v38 }
  0xe5   :  { %v1662_v49 = vpop.f32.mrf.mxu0  ;;  %v1112_v55 = vadd.f32 %v1111_v44, %v1110_v5  ;;  %v1309_v56 = vadd.f32 %v1308_v52, %v1307_v28  ;;  %v2263_v12 = vpop.f32.mrf.mxu1 }
  0xe6   :  { %v1119_v58 = vsel %vm1099_vm3, %v1045_v50, 0.0  ;;  %980 = vst.msk [vmem:[%s2734_s4 + $0x24] sm:$0xf] %vm970_vm2, %v1558_v48  ;;  %v1043_v59 = vunpack.c.l.bf16 %v718_v47  ;;  %v1044_v63 = vunpack.c.h.bf16 %v718_v47  ;;  %v1245_v7 = vmul.f32 %v1045_v50, %v1045_v50 }
  0xe7   :  { %v507_v0 = vpop.f32.mrf.mxu0  ;;  %v1311_v6 = vadd.f32 %v1310_v54, %v1309_v56  ;;  %v1114_v8 = vadd.f32 %v1113_v53, %v1112_v55  ;;  %v1563_v11 = vpack.c.bf16 %v1662_v49, %v1662_v49  ;;  %v1246_v13 = vmul.f32 %v1046_v46, %v1046_v46  ;;  %v2271_v25 = vpop.f32.mrf.mxu1 }
  0xe8   :  { %v1115_v15 = vsel %vm1099_vm3, %v1043_v59, 0.0  ;;  %v1117_v16 = vsel %vm1099_vm3, %v1044_v63, 0.0  ;;  %v1243_v17 = vmul.f32 %v1043_v59, %v1043_v59  ;;  %v1244_v22 = vmul.f32 %v1044_v63, %v1044_v63 }
  0xe9   :  { %v1663_v18 = vpop.f32.mrf.mxu0  ;;  %v1116_v21 = vadd.f32 %v1115_v15, %v1114_v8  ;;  %v1313_v23 = vadd.f32 %v1312_v57, %v1311_v6  ;;  %985 = vst.msk [vmem:[%s2734_s4 + $0x38] sm:$0xf] %vm970_vm2, %v1563_v11  ;;  %v1561_v24 = vpack.c.bf16 %v507_v0, %v507_v0  ;;  %v1583_v31 = vpack.c.bf16 %v2263_v12, %v2263_v12  ;;  %v2281_v35 = vpop.f32.mrf.mxu1 }
  0xea   :  { %v1314_v26 = vsel %vm1099_vm3, %v1243_v17, 0.0  ;;  %v721_v27 = vpack.c.bf16 %v1663_v18, %v1662_v49  ;;  %v1564_v10 = vpack.c.bf16 %v1663_v18, %v1663_v18  ;;  %v1316_v33 = vsel %vm1099_vm3, %v1244_v22, 0.0 }
  0xeb   :  { %v510_v30 = vpop.f32.mrf.mxu0  ;;  %v1118_v14 = vadd.f32 %v1117_v16, %v1116_v21  ;;  %v1315_v32 = vadd.f32 %v1314_v26, %v1313_v23  ;;  %983 = vst.msk [vmem:[%s2734_s4 + $0x30] sm:$0xf] %vm970_vm2, %v1561_v24  ;;  %1005 = vst.msk [vmem:[%s2734_s4 + $0x88] sm:$0xf] %vm970_vm2, %v1583_v31  ;;  %v1581_v37 = vpack.c.bf16 %v2271_v25, %v2271_v25  ;;  %v2293_v61 = vpop.f32.mrf.mxu1  ;;  %v1121_v62 = vsel %vm1099_vm3, %v1046_v46, 0.0 }
  0xec   :  { %v720_v34 = vpack.c.bf16 %v510_v30, %v507_v0  ;;  %986 = vst.msk [vmem:[%s2734_s4 + $0x3c] sm:$0xf] %vm970_vm2, %v1564_v10  ;;  %v1049_v29 = vunpack.c.l.bf16 %v721_v27  ;;  %v1050_v20 = vunpack.c.h.bf16 %v721_v27  ;;  %v1562_v36 = vpack.c.bf16 %v510_v30, %v510_v30 }
  0xed   :  { %v1666_v60 = vpop.f32.mrf.mxu0  ;;  %v1120_v1 = vadd.f32 %v1119_v58, %v1118_v14  ;;  %v1317_v39 = vadd.f32 %v1316_v33, %v1315_v32  ;;  %v1318_v4 = vsel %vm1099_vm3, %v1245_v7, 0.0  ;;  %v1320_v51 = vsel %vm1099_vm3, %v1246_v13, 0.0  ;;  %1003 = vst.msk [vmem:[%s2734_s4 + $0x80] sm:$0xf] %vm970_vm2, %v1581_v37  ;;  %v2308_v42 = vpop.f32.mrf.mxu1 }
  0xee   :  { %v1047_v40 = vunpack.c.l.bf16 %v720_v34  ;;  %v1048_v45 = vunpack.c.h.bf16 %v720_v34  ;;  %984 = vst.msk [vmem:[%s2734_s4 + $0x34] sm:$0xf] %vm970_vm2, %v1562_v36  ;;  %v1127_v19 = vsel %vm1099_vm3, %v1049_v29, 0.0  ;;  %v1249_v43 = vmul.f32 %v1049_v29, %v1049_v29 }
  0xef   :  { %v523_v2 = vpop.f32.mrf.mxu0  ;;  %v1319_v3 = vadd.f32 %v1318_v4, %v1317_v39  ;;  %v1122_v9 = vadd.f32 %v1121_v62, %v1120_v1  ;;  %v1250_v38 = vmul.f32 %v1050_v20, %v1050_v20  ;;  %v1567_v46 = vpack.c.bf16 %v1666_v60, %v1666_v60  ;;  %v2310_v48 = vpop.f32.mrf.mxu1 }
  0xf0   :  { %v1123_v41 = vsel %vm1099_vm3, %v1047_v40, 0.0  ;;  %v1247_v44 = vmul.f32 %v1047_v40, %v1047_v40  ;;  %v1248_v5 = vmul.f32 %v1048_v45, %v1048_v45  ;;  %v1565_v47 = vpack.c.bf16 %v523_v2, %v523_v2 }
  0xf1   :  { %v1667_v28 = vpop.f32.mrf.mxu0  ;;  %v1124_v50 = vadd.f32 %v1123_v41, %v1122_v9  ;;  %v1321_v52 = vadd.f32 %v1320_v51, %v1319_v3  ;;  %v1125_v49 = vsel %vm1099_vm3, %v1048_v45, 0.0  ;;  %989 = vst.msk [vmem:[%s2734_s4 + $0x48] sm:$0xf] %vm970_vm2, %v1567_v46  ;;  %v2322_v0 = vpop.f32.mrf.mxu1  ;;  %v1584_v13 = vpack.c.bf16 %v2281_v35, %v2281_v35 }
  0xf2   :  { %v1322_v53 = vsel %vm1099_vm3, %v1247_v44, 0.0  ;;  %v723_v54 = vpack.c.bf16 %v1667_v28, %v1666_v60  ;;  %v1568_v55 = vpack.c.bf16 %v1667_v28, %v1667_v28  ;;  %987 = vst.msk [vmem:[%s2734_s4 + $0x40] sm:$0xf] %vm970_vm2, %v1565_v47  ;;  %v1324_v6 = vsel %vm1099_vm3, %v1248_v5, 0.0 }
  0xf3   :  { %v526_v56 = vpop.f32.mrf.mxu0  ;;  %v1126_v57 = vadd.f32 %v1125_v49, %v1124_v50  ;;  %v1323_v58 = vadd.f32 %v1322_v53, %v1321_v52  ;;  %v2335_v21 = vpop.f32.mrf.mxu1  ;;  %v1129_v22 = vsel %vm1099_vm3, %v1050_v20, 0.0  ;;  %v1326_v23 = vsel %vm1099_vm3, %v1249_v43, 0.0  ;;  %1006 = vst.msk [vmem:[%s2734_s4 + $0x8c] sm:$0xf] %vm970_vm2, %v1584_v13 }
  0xf4   :  { %v722_v59 = vpack.c.bf16 %v526_v56, %v523_v2  ;;  %v1566_v63 = vpack.c.bf16 %v526_v56, %v526_v56  ;;  %990 = vst.msk [vmem:[%s2734_s4 + $0x4c] sm:$0xf] %vm970_vm2, %v1568_v55  ;;  %v1053_v7 = vunpack.c.l.bf16 %v723_v54  ;;  %v1054_v8 = vunpack.c.h.bf16 %v723_v54 }
  0xf5   :  { %v1670_v11 = vpop.f32.mrf.mxu0  ;;  %v1128_v15 = vadd.f32 %v1127_v19, %v1126_v57  ;;  %v1325_v16 = vadd.f32 %v1324_v6, %v1323_v58  ;;  %v1328_v26 = vsel %vm1099_vm3, %v1250_v38, 0.0  ;;  %v2345_v31 = vpop.f32.mrf.mxu1 }
  0xf6   :  { %988 = vst.msk [vmem:[%s2734_s4 + $0x44] sm:$0xf] %vm970_vm2, %v1566_v63  ;;  %v1051_v17 = vunpack.c.l.bf16 %v722_v59  ;;  %v1052_v18 = vunpack.c.h.bf16 %v722_v59  ;;  %v1253_v14 = vmul.f32 %v1053_v7, %v1053_v7  ;;  %v1254_v32 = vmul.f32 %v1054_v8, %v1054_v8 }
  0xf7   :  { %v539_v24 = vpop.f32.mrf.mxu0  ;;  %v1327_v27 = vadd.f32 %v1326_v23, %v1325_v16  ;;  %v1130_v10 = vadd.f32 %v1129_v22, %v1128_v15  ;;  %v1571_v60 = vpack.c.bf16 %v1670_v11, %v1670_v11  ;;  %v2347_v1 = vpop.f32.mrf.mxu1  ;;  %v1135_v41 = vsel %vm1099_vm3, %v1053_v7, 0.0 }
  0xf8   :  { %v1131_v30 = vsel %vm1099_vm3, %v1051_v17, 0.0  ;;  %v1251_v33 = vmul.f32 %v1051_v17, %v1051_v17  ;;  %v1252_v34 = vmul.f32 %v1052_v18, %v1052_v18  ;;  %v1569_v37 = vpack.c.bf16 %v539_v24, %v539_v24 }
  0xf9   :  { %v1671_v29 = vpop.f32.mrf.mxu0  ;;  %v1132_v20 = vadd.f32 %v1131_v30, %v1130_v10  ;;  %v1329_v36 = vadd.f32 %v1328_v26, %v1327_v27  ;;  %v1133_v39 = vsel %vm1099_vm3, %v1052_v18, 0.0  ;;  %993 = vst.msk [vmem:[%s2734_s4 + $0x58] sm:$0xf] %vm970_vm2, %v1571_v60  ;;  %v2359_v9 = vpop.f32.mrf.mxu1  ;;  %v1137_v49 = vsel %vm1099_vm3, %v1054_v8, 0.0 }
  0xfa   :  { %v1330_v40 = vsel %vm1099_vm3, %v1251_v33, 0.0  ;;  %v725_v45 = vpack.c.bf16 %v1671_v29, %v1670_v11  ;;  %v1572_v62 = vpack.c.bf16 %v1671_v29, %v1671_v29  ;;  %991 = vst.msk [vmem:[%s2734_s4 + $0x50] sm:$0xf] %vm970_vm2, %v1569_v37  ;;  %v1332_v43 = vsel %vm1099_vm3, %v1252_v34, 0.0 }
  0xfb   :  { %v542_v4 = vpop.f32.mrf.mxu0  ;;  %v1134_v51 = vadd.f32 %v1133_v39, %v1132_v20  ;;  %v1331_v2 = vadd.f32 %v1330_v40, %v1329_v36  ;;  %v2371_v47 = vpop.f32.mrf.mxu1  ;;  %v1334_v53 = vsel %vm1099_vm3, %v1253_v14, 0.0  ;;  %v1336_v55 = vsel %vm1099_vm3, %v1254_v32, 0.0 }
  0xfc   :  { %v724_v3 = vpack.c.bf16 %v542_v4, %v539_v24  ;;  %v1570_v19 = vpack.c.bf16 %v542_v4, %v542_v4  ;;  %994 = vst.msk [vmem:[%s2734_s4 + $0x5c] sm:$0xf] %vm970_vm2, %v1572_v62  ;;  %v1057_v38 = vunpack.c.l.bf16 %v725_v45  ;;  %v1058_v44 = vunpack.c.h.bf16 %v725_v45 }
  0xfd   :  { %v1674_v5 = vpop.f32.mrf.mxu0  ;;  %v1136_v28 = vadd.f32 %v1135_v41, %v1134_v51  ;;  %v1333_v50 = vadd.f32 %v1332_v43, %v1331_v2  ;;  %v2377_v59 = vpop.f32.mrf.mxu1 }
  0xfe   :  { %992 = vst.msk [vmem:[%s2734_s4 + $0x54] sm:$0xf] %vm970_vm2, %v1570_v19  ;;  %v1055_v52 = vunpack.c.l.bf16 %v724_v3  ;;  %v1056_v46 = vunpack.c.h.bf16 %v724_v3  ;;  %v1257_v63 = vmul.f32 %v1057_v38, %v1057_v38  ;;  %v1258_v6 = vmul.f32 %v1058_v44, %v1058_v44 }
  0xff   :  { %v555_v54 = vpop.f32.mrf.mxu0  ;;  %v1335_v56 = vadd.f32 %v1334_v53, %v1333_v50  ;;  %v1138_v57 = vadd.f32 %v1137_v49, %v1136_v28  ;;  %v1575_v17 = vpack.c.bf16 %v1674_v5, %v1674_v5  ;;  %v2379_v18 = vpop.f32.mrf.mxu1  ;;  %v1143_v34 = vsel %vm1099_vm3, %v1057_v38, 0.0 }
 0x100   :  { %v1139_v58 = vsel %vm1099_vm3, %v1055_v52, 0.0  ;;  %v1255_v7 = vmul.f32 %v1055_v52, %v1055_v52  ;;  %v1256_v11 = vmul.f32 %v1056_v46, %v1056_v46  ;;  %v1573_v8 = vpack.c.bf16 %v555_v54, %v555_v54 }
 0x101   :  { %v1675_v13 = vpop.f32.mrf.mxu0  ;;  %v1140_v15 = vadd.f32 %v1139_v58, %v1138_v57  ;;  %v1337_v16 = vadd.f32 %v1336_v55, %v1335_v56  ;;  %v1141_v22 = vsel %vm1099_vm3, %v1056_v46, 0.0  ;;  %997 = vst.msk [vmem:[%s2734_s4 + $0x68] sm:$0xf] %vm970_vm2, %v1575_v17  ;;  %v2391_v33 = vpop.f32.mrf.mxu1  ;;  %v1145_v62 = vsel %vm1099_vm3, %v1058_v44, 0.0 }
 0x102   :  { %v1338_v23 = vsel %vm1099_vm3, %v1255_v7, 0.0  ;;  %v727_v24 = vpack.c.bf16 %v1675_v13, %v1674_v5  ;;  %v1576_v26 = vpack.c.bf16 %v1675_v13, %v1675_v13  ;;  %995 = vst.msk [vmem:[%s2734_s4 + $0x60] sm:$0xf] %vm970_vm2, %v1573_v8  ;;  %v1340_v29 = vsel %vm1099_vm3, %v1256_v11, 0.0 }
 0x103   :  { %v558_v27 = vpop.f32.mrf.mxu0  ;;  %v1142_v10 = vadd.f32 %v1141_v22, %v1140_v15  ;;  %v1339_v30 = vadd.f32 %v1338_v23, %v1337_v16  ;;  %v2403_v45 = vpop.f32.mrf.mxu1  ;;  %v1342_v4 = vsel %vm1099_vm3, %v1257_v63, 0.0  ;;  %v1344_v51 = vsel %vm1099_vm3, %v1258_v6, 0.0 }
 0x104   :  { %v726_v14 = vpack.c.bf16 %v558_v27, %v555_v54  ;;  %v1574_v32 = vpack.c.bf16 %v558_v27, %v558_v27  ;;  %998 = vst.msk [vmem:[%s2734_s4 + $0x6c] sm:$0xf] %vm970_vm2, %v1576_v26  ;;  %v1061_v20 = vunpack.c.l.bf16 %v727_v24  ;;  %v1062_v19 = vunpack.c.h.bf16 %v727_v24 }
 0x105   :  { %v1678_v36 = vpop.f32.mrf.mxu0  ;;  %v1144_v60 = vadd.f32 %v1143_v34, %v1142_v10  ;;  %v1341_v37 = vadd.f32 %v1340_v29, %v1339_v30  ;;  %v2409_v38 = vpop.f32.mrf.mxu1 }
 0x106   :  { %996 = vst.msk [vmem:[%s2734_s4 + $0x64] sm:$0xf] %vm970_vm2, %v1574_v32  ;;  %v1059_v39 = vunpack.c.l.bf16 %v726_v14  ;;  %v1060_v40 = vunpack.c.h.bf16 %v726_v14  ;;  %v1151_v5 = vsel %vm1099_vm3, %v1061_v20, 0.0  ;;  %v1261_v28 = vmul.f32 %v1061_v20, %v1061_v20 }
 0x107   :  { %v571_v2 = vpop.f32.mrf.mxu0  ;;  %v1343_v3 = vadd.f32 %v1342_v4, %v1341_v37  ;;  %v1146_v41 = vadd.f32 %v1145_v62, %v1144_v60  ;;  %v1579_v53 = vpack.c.bf16 %v1678_v36, %v1678_v36  ;;  %v2412_v55 = vpop.f32.mrf.mxu1  ;;  %v1262_v16 = vmul.f32 %v1062_v19, %v1062_v19 }
 0x108   :  { %v1147_v43 = vsel %vm1099_vm3, %v1059_v39, 0.0  ;;  %v1259_v50 = vmul.f32 %v1059_v39, %v1059_v39  ;;  %v1260_v52 = vmul.f32 %v1060_v40, %v1060_v40  ;;  %v1577_v54 = vpack.c.bf16 %v571_v2, %v571_v2 }
 0x109   :  { %v1679_v46 = vpop.f32.mrf.mxu0  ;;  %v1148_v49 = vadd.f32 %v1147_v43, %v1146_v41  ;;  %v1345_v44 = vadd.f32 %v1344_v51, %v1343_v3  ;;  %v1149_v56 = vsel %vm1099_vm3, %v1060_v40, 0.0  ;;  %1001 = vst.msk [vmem:[%s2734_s4 + $0x78] sm:$0xf] %vm970_vm2, %v1579_v53  ;;  %v2429_v23 = vpop.f32.mrf.mxu1  ;;  %v1153_v30 = vsel %vm1099_vm3, %v1062_v19, 0.0 }
 0x10a   :  { %v1346_v57 = vsel %vm1099_vm3, %v1259_v50, 0.0  ;;  %v729_v58 = vpack.c.bf16 %v1679_v46, %v1678_v36  ;;  %v1580_v63 = vpack.c.bf16 %v1679_v46, %v1679_v46  ;;  %999 = vst.msk [vmem:[%s2734_s4 + $0x70] sm:$0xf] %vm970_vm2, %v1577_v54  ;;  %v1348_v17 = vsel %vm1099_vm3, %v1260_v52, 0.0 }
 0x10b   :  { %v574_v6 = vpop.f32.mrf.mxu0  ;;  %v1150_v7 = vadd.f32 %v1149_v56, %v1148_v49  ;;  %v1347_v11 = vadd.f32 %v1346_v57, %v1345_v44  ;;  %v1350_v14 = vsel %vm1099_vm3, %v1261_v28, 0.0  ;;  %v731_v20 = vpack.c.bf16 %v2281_v35, %v2263_v12  ;;  %v2442_v40 = vpop.f32.mrf.mxu1 }
 0x10c   :  { %v728_v13 = vpack.c.bf16 %v574_v6, %v571_v2  ;;  %v1578_v15 = vpack.c.bf16 %v574_v6, %v574_v6  ;;  %1002 = vst.msk [vmem:[%s2734_s4 + $0x7c] sm:$0xf] %vm970_vm2, %v1580_v63  ;;  %v1065_v8 = vunpack.c.l.bf16 %v729_v58  ;;  %v1066_v22 = vunpack.c.h.bf16 %v729_v58 }
 0x10d   :  { %v1152_v24 = vadd.f32 %v1151_v5, %v1150_v7  ;;  %v1349_v26 = vadd.f32 %v1348_v17, %v1347_v11  ;;  %v1352_v36 = vsel %vm1099_vm3, %v1262_v16, 0.0  ;;  %v730_v41 = vpack.c.bf16 %v2293_v61, %v2271_v25  ;;  %v2461_v46 = vpop.f32.mrf.mxu1 }
 0x10e   :  { %1000 = vst.msk [vmem:[%s2734_s4 + $0x74] sm:$0xf] %vm970_vm2, %v1578_v15  ;;  %v1063_v27 = vunpack.c.l.bf16 %v728_v13  ;;  %v1064_v10 = vunpack.c.h.bf16 %v728_v13  ;;  %v1159_v60 = vsel %vm1099_vm3, %v1065_v8, 0.0  ;;  %v1265_v62 = vmul.f32 %v1065_v8, %v1065_v8 }
 0x10f   :  { %v1351_v32 = vadd.f32 %v1350_v14, %v1349_v26  ;;  %v1154_v34 = vadd.f32 %v1153_v30, %v1152_v24  ;;  %v1266_v4 = vmul.f32 %v1066_v22, %v1066_v22  ;;  %v1582_v12 = vpack.c.bf16 %v2293_v61, %v2293_v61  ;;  %v2487_v17 = vpop.f32.mrf.mxu1 }
 0x110   :  { %v1155_v29 = vsel %vm1099_vm3, %v1063_v27, 0.0  ;;  %v1263_v37 = vmul.f32 %v1063_v27, %v1063_v27  ;;  %v1264_v39 = vmul.f32 %v1064_v10, %v1064_v10  ;;  %v1157_v3 = vsel %vm1099_vm3, %v1064_v10, 0.0 }
 0x111   :  { %v1156_v51 = vadd.f32 %v1155_v29, %v1154_v34  ;;  %v1353_v2 = vadd.f32 %v1352_v36, %v1351_v32  ;;  %v1587_v5 = vpack.c.bf16 %v2308_v42, %v2308_v42  ;;  %v1585_v28 = vpack.c.bf16 %v2310_v48, %v2310_v48  ;;  %1004 = vst.msk [vmem:[%s2734_s4 + $0x84] sm:$0xf] %vm970_vm2, %v1582_v12 }
 0x112   :  { %v1354_v19 = vsel %vm1099_vm3, %v1263_v37, 0.0  ;;  %v1356_v50 = vsel %vm1099_vm3, %v1264_v39, 0.0  ;;  %v1067_v52 = vunpack.c.l.bf16 %v730_v41  ;;  %v1068_v25 = vunpack.c.h.bf16 %v730_v41 }
 0x113   :  { %v1158_v35 = vadd.f32 %v1157_v3, %v1156_v51  ;;  %v1355_v43 = vadd.f32 %v1354_v19, %v1353_v2  ;;  %v1588_v61 = vpack.c.bf16 %v2322_v0, %v2322_v0  ;;  %v1069_v53 = vunpack.c.l.bf16 %v731_v20  ;;  %1009 = vst.msk [vmem:[%s2734_s4 + $0x98] sm:$0xf] %vm970_vm2, %v1587_v5  ;;  %1007 = vst.msk [vmem:[%s2734_s4 + $0x90] sm:$0xf] %vm970_vm2, %v1585_v28 }
 0x114   :  { %v1586_v54 = vpack.c.bf16 %v2335_v21, %v2335_v21  ;;  %v1161_v56 = vsel %vm1099_vm3, %v1066_v22, 0.0  ;;  %v1358_v57 = vsel %vm1099_vm3, %v1265_v62, 0.0  ;;  %v1267_v58 = vmul.f32 %v1067_v52, %v1067_v52 }
 0x115   :  { %v1160_v49 = vadd.f32 %v1159_v60, %v1158_v35  ;;  %v1357_v44 = vadd.f32 %v1356_v50, %v1355_v43  ;;  %1010 = vst.msk [vmem:[%s2734_s4 + $0x9c] sm:$0xf] %vm970_vm2, %v1588_v61  ;;  %v732_v63 = vpack.c.bf16 %v2335_v21, %v2310_v48  ;;  %v1070_v7 = vunpack.c.h.bf16 %v731_v20 }
 0x116   :  { %1008 = vst.msk [vmem:[%s2734_s4 + $0x94] sm:$0xf] %vm970_vm2, %v1586_v54  ;;  %v1360_v13 = vsel %vm1099_vm3, %v1266_v4, 0.0  ;;  %v1163_v15 = vsel %vm1099_vm3, %v1067_v52, 0.0  ;;  %v1268_v16 = vmul.f32 %v1068_v25, %v1068_v25  ;;  %v1269_v8 = vmul.f32 %v1069_v53, %v1069_v53 }
 0x117   :  { %v1359_v6 = vadd.f32 %v1358_v57, %v1357_v44  ;;  %v1162_v11 = vadd.f32 %v1161_v56, %v1160_v49  ;;  %v733_v48 = vpack.c.bf16 %v2322_v0, %v2308_v42  ;;  %v1167_v21 = vsel %vm1099_vm3, %v1069_v53, 0.0  ;;  %v2500_v0 = vpop.f32.mrf.mxu1 }
 0x118   :  { %v1165_v26 = vsel %vm1099_vm3, %v1068_v25, 0.0  ;;  %v1362_v27 = vsel %vm1099_vm3, %v1267_v58, 0.0  ;;  %v1071_v10 = vunpack.c.l.bf16 %v732_v63  ;;  %v1169_v30 = vsel %vm1099_vm3, %v1070_v7, 0.0 }
 0x119   :  { %v1164_v22 = vadd.f32 %v1163_v15, %v1162_v11  ;;  %v1361_v24 = vadd.f32 %v1360_v13, %v1359_v6  ;;  %v1270_v14 = vmul.f32 %v1070_v7, %v1070_v7  ;;  %v1364_v29 = vsel %vm1099_vm3, %v1268_v16, 0.0 }
 0x11a   :  { %v1072_v20 = vunpack.c.h.bf16 %v732_v63  ;;  %v1591_v36 = vpack.c.bf16 %v2345_v31, %v2345_v31  ;;  %v1589_v42 = vpack.c.bf16 %v2347_v1, %v2347_v1  ;;  %v1366_v60 = vsel %vm1099_vm3, %v1269_v8, 0.0 }
 0x11b   :  { %v1166_v32 = vadd.f32 %v1165_v26, %v1164_v22  ;;  %v1363_v34 = vadd.f32 %v1362_v27, %v1361_v24  ;;  %v1073_v62 = vunpack.c.l.bf16 %v733_v48  ;;  %v1271_v4 = vmul.f32 %v1071_v10, %v1071_v10 }
 0x11c   :  { %1013 = vst.msk [vmem:[%s2734_s4 + $0xa8] sm:$0xf] %vm970_vm2, %v1591_v36  ;;  %1011 = vst.msk [vmem:[%s2734_s4 + $0xa0] sm:$0xf] %vm970_vm2, %v1589_v42  ;;  %v1592_v51 = vpack.c.bf16 %v2359_v9, %v2359_v9  ;;  %v734_v2 = vpack.c.bf16 %v2371_v47, %v2347_v1  ;;  %v1590_v3 = vpack.c.bf16 %v2371_v47, %v2371_v47  ;;  %v1368_v43 = vsel %vm1099_vm3, %v1270_v14, 0.0  ;;  %v2531_v1 = vpop.f32.mrf.mxu1 }
 0x11d   :  { %v1168_v37 = vadd.f32 %v1167_v21, %v1166_v32  ;;  %v1365_v39 = vadd.f32 %v1364_v29, %v1363_v34  ;;  %v1595_v12 = vpack.c.bf16 %v2377_v59, %v2377_v59  ;;  %v1593_v35 = vpack.c.bf16 %v2379_v18, %v2379_v18 }
 0x11e   :  { %v1074_v5 = vunpack.c.h.bf16 %v733_v48  ;;  %v1171_v28 = vsel %vm1099_vm3, %v1071_v10, 0.0  ;;  %v1272_v50 = vmul.f32 %v1072_v20, %v1072_v20  ;;  %1014 = vst.msk [vmem:[%s2734_s4 + $0xac] sm:$0xf] %vm970_vm2, %v1592_v51  ;;  %1012 = vst.msk [vmem:[%s2734_s4 + $0xa4] sm:$0xf] %vm970_vm2, %v1590_v3  ;;  %v1273_v47 = vmul.f32 %v1073_v62, %v1073_v62  ;;  %v2553_v11 = vpop.f32.mrf.mxu1 }
 0x11f   :  { %v1367_v19 = vadd.f32 %v1366_v60, %v1365_v39  ;;  %v1170_v41 = vadd.f32 %v1169_v30, %v1168_v37  ;;  %1017 = vst.msk [vmem:[%s2734_s4 + $0xb8] sm:$0xf] %vm970_vm2, %v1595_v12  ;;  %1015 = vst.msk [vmem:[%s2734_s4 + $0xb0] sm:$0xf] %vm970_vm2, %v1593_v35  ;;  %v1596_v61 = vpack.c.bf16 %v2391_v33, %v2391_v33  ;;  %v1173_v49 = vsel %vm1099_vm3, %v1072_v20, 0.0 }
 0x120   :  { %v1370_v44 = vsel %vm1099_vm3, %v1271_v4, 0.0  ;;  %v735_v53 = vpack.c.bf16 %v2359_v9, %v2345_v31  ;;  %v1075_v54 = vunpack.c.l.bf16 %v734_v2  ;;  %v1175_v58 = vsel %vm1099_vm3, %v1073_v62, 0.0 }
 0x121   :  { %v1172_v52 = vadd.f32 %v1171_v28, %v1170_v41  ;;  %v1369_v25 = vadd.f32 %v1368_v43, %v1367_v19  ;;  %1018 = vst.msk [vmem:[%s2734_s4 + $0xbc] sm:$0xf] %vm970_vm2, %v1596_v61  ;;  %v1274_v63 = vmul.f32 %v1074_v5, %v1074_v5  ;;  %v1372_v6 = vsel %vm1099_vm3, %v1272_v50, 0.0 }
 0x122   :  { %v1076_v7 = vunpack.c.h.bf16 %v734_v2  ;;  %v1177_v13 = vsel %vm1099_vm3, %v1074_v5, 0.0  ;;  %v1374_v31 = vsel %vm1099_vm3, %v1273_v47, 0.0  ;;  %v1077_v16 = vunpack.c.l.bf16 %v735_v53 }
 0x123   :  { %v1174_v56 = vadd.f32 %v1173_v49, %v1172_v52  ;;  %v1371_v57 = vadd.f32 %v1370_v44, %v1369_v25  ;;  %v1275_v8 = vmul.f32 %v1075_v54, %v1075_v54  ;;  %v736_v22 = vpack.c.bf16 %v2403_v45, %v2379_v18  ;;  %v2569_v18 = vpop.f32.mrf.mxu1 }
 0x124   :  { %v1594_v24 = vpack.c.bf16 %v2403_v45, %v2403_v45  ;;  %v1078_v21 = vunpack.c.h.bf16 %v735_v53  ;;  %v1376_v27 = vsel %vm1099_vm3, %v1274_v63, 0.0  ;;  %v1179_v10 = vsel %vm1099_vm3, %v1075_v54, 0.0 }
 0x125   :  { %v1176_v9 = vadd.f32 %v1175_v58, %v1174_v56  ;;  %v1373_v15 = vadd.f32 %v1372_v6, %v1371_v57  ;;  %v1276_v30 = vmul.f32 %v1076_v7, %v1076_v7  ;;  %v737_v14 = vpack.c.bf16 %v2391_v33, %v2377_v59  ;;  %v2591_v3 = vpop.f32.mrf.mxu1 }
 0x126   :  { %1016 = vst.msk [vmem:[%s2734_s4 + $0xb4] sm:$0xf] %vm970_vm2, %v1594_v24  ;;  %v1599_v34 = vpack.c.bf16 %v2409_v38, %v2409_v38  ;;  %v1597_v29 = vpack.c.bf16 %v2412_v55, %v2412_v55  ;;  %v1277_v20 = vmul.f32 %v1077_v16, %v1077_v16  ;;  %v1181_v36 = vsel %vm1099_vm3, %v1076_v7, 0.0 }
 0x127   :  { %v1375_v48 = vadd.f32 %v1374_v31, %v1373_v15  ;;  %v1178_v26 = vadd.f32 %v1177_v13, %v1176_v9  ;;  %v1378_v59 = vsel %vm1099_vm3, %v1275_v8, 0.0  ;;  %v1079_v33 = vunpack.c.l.bf16 %v736_v22  ;;  %v2611_v54 = vpop.f32.mrf.mxu1 }
 0x128   :  { %v1183_v42 = vsel %vm1099_vm3, %v1077_v16, 0.0  ;;  %v1278_v60 = vmul.f32 %v1078_v21, %v1078_v21  ;;  %1021 = vst.msk [vmem:[%s2734_s4 + $0xc8] sm:$0xf] %vm970_vm2, %v1599_v34  ;;  %1019 = vst.msk [vmem:[%s2734_s4 + $0xc0] sm:$0xf] %vm970_vm2, %v1597_v29  ;;  %v1380_v62 = vsel %vm1099_vm3, %v1276_v30, 0.0  ;;  %v1080_v4 = vunpack.c.h.bf16 %v736_v22 }
 0x129   :  { %v1180_v32 = vadd.f32 %v1179_v10, %v1178_v26  ;;  %v1377_v45 = vadd.f32 %v1376_v27, %v1375_v48  ;;  %v1600_v51 = vpack.c.bf16 %v2429_v23, %v2429_v23  ;;  %v1598_v2 = vpack.c.bf16 %v2442_v40, %v2442_v40  ;;  %v2632_v22 = vpop.f32.mrf.mxu1 }
 0x12a   :  { %v1185_v19 = vsel %vm1099_vm3, %v1078_v21, 0.0  ;;  %v1081_v35 = vunpack.c.l.bf16 %v737_v14  ;;  %v1382_v43 = vsel %vm1099_vm3, %v1277_v20, 0.0  ;;  %v1082_v5 = vunpack.c.h.bf16 %v737_v14 }
 0x12b   :  { %v1182_v37 = vadd.f32 %v1181_v36, %v1180_v32  ;;  %v1379_v39 = vadd.f32 %v1378_v59, %v1377_v45  ;;  %v1279_v28 = vmul.f32 %v1079_v33, %v1079_v33  ;;  %1022 = vst.msk [vmem:[%s2734_s4 + $0xcc] sm:$0xf] %vm970_vm2, %v1600_v51  ;;  %v738_v50 = vpack.c.bf16 %v2442_v40, %v2412_v55 }
 0x12c   :  { %1020 = vst.msk [vmem:[%s2734_s4 + $0xc4] sm:$0xf] %vm970_vm2, %v1598_v2  ;;  %v1603_v25 = vpack.c.bf16 %v2461_v46, %v2461_v46  ;;  %v1601_v61 = vpack.c.bf16 %v2487_v17, %v2487_v17  ;;  %v1384_v49 = vsel %vm1099_vm3, %v1278_v60, 0.0  ;;  %v1187_v44 = vsel %vm1099_vm3, %v1079_v33, 0.0 }
 0x12d   :  { %v1184_v41 = vadd.f32 %v1183_v42, %v1182_v37  ;;  %v1381_v12 = vadd.f32 %v1380_v62, %v1379_v39  ;;  %v1280_v53 = vmul.f32 %v1080_v4, %v1080_v4  ;;  %v1281_v55 = vmul.f32 %v1081_v35, %v1081_v35 }
 0x12e   :  { %v739_v57 = vpack.c.bf16 %v2429_v23, %v2409_v38  ;;  %1025 = vst.msk [vmem:[%s2734_s4 + $0xd8] sm:$0xf] %vm970_vm2, %v1603_v25  ;;  %1023 = vst.msk [vmem:[%s2734_s4 + $0xd0] sm:$0xf] %vm970_vm2, %v1601_v61  ;;  %v1191_v58 = vsel %vm1099_vm3, %v1081_v35, 0.0  ;;  %v1189_v63 = vsel %vm1099_vm3, %v1080_v4, 0.0  ;;  %v1083_v7 = vunpack.c.l.bf16 %v738_v50 }
 0x12f   :  { %v1383_v47 = vadd.f32 %v1382_v43, %v1381_v12  ;;  %v1186_v52 = vadd.f32 %v1185_v19, %v1184_v41  ;;  %v1386_v6 = vsel %vm1099_vm3, %v1279_v28, 0.0  ;;  %v1193_v13 = vsel %vm1099_vm3, %v1082_v5, 0.0 }
 0x130   :  { %v1604_v31 = vpack.c.bf16 %v2500_v0, %v2500_v0  ;;  %v1282_v9 = vmul.f32 %v1082_v5, %v1082_v5  ;;  %v1388_v15 = vsel %vm1099_vm3, %v1280_v53, 0.0  ;;  %v1084_v16 = vunpack.c.h.bf16 %v738_v50 }
 0x131   :  { %v1188_v40 = vadd.f32 %v1187_v44, %v1186_v52  ;;  %v1385_v56 = vadd.f32 %v1384_v49, %v1383_v47  ;;  %v1602_v8 = vpack.c.bf16 %v2531_v1, %v2531_v1  ;;  %v1390_v24 = vsel %vm1099_vm3, %v1281_v55, 0.0 }
 0x132   :  { %v1085_v26 = vunpack.c.l.bf16 %v739_v57  ;;  %1026 = vst.msk [vmem:[%s2734_s4 + $0xdc] sm:$0xf] %vm970_vm2, %v1604_v31  ;;  %v1283_v27 = vmul.f32 %v1083_v7, %v1083_v7  ;;  %v740_v10 = vpack.c.bf16 %v2531_v1, %v2487_v17  ;;  %v1607_v30 = vpack.c.bf16 %v2553_v11, %v2553_v11  ;;  %v699_v17 = vpop.f32.mrf.mxu1 }
 0x133   :  { %v1190_v38 = vadd.f32 %v1189_v63, %v1188_v40  ;;  %v1387_v23 = vadd.f32 %v1386_v6, %v1385_v56  ;;  %1024 = vst.msk [vmem:[%s2734_s4 + $0xd4] sm:$0xf] %vm970_vm2, %v1602_v8  ;;  %v1605_v14 = vpack.c.bf16 %v2569_v18, %v2569_v18  ;;  %v1086_v45 = vunpack.c.h.bf16 %v739_v57 }
 0x134   :  { %v1392_v29 = vsel %vm1099_vm3, %v1282_v9, 0.0  ;;  %v1195_v20 = vsel %vm1099_vm3, %v1083_v7, 0.0  ;;  %v1284_v36 = vmul.f32 %v1084_v16, %v1084_v16  ;;  %1029 = vst.msk [vmem:[%s2734_s4 + $0xe8] sm:$0xf] %vm970_vm2, %v1607_v30  ;;  %v1285_v1 = vmul.f32 %v1085_v26, %v1085_v26 }
 0x135   :  { %v1192_v48 = vadd.f32 %v1191_v58, %v1190_v38  ;;  %v1389_v21 = vadd.f32 %v1388_v15, %v1387_v23  ;;  %1027 = vst.msk [vmem:[%s2734_s4 + $0xe0] sm:$0xf] %vm970_vm2, %v1605_v14  ;;  %v1197_v33 = vsel %vm1099_vm3, %v1084_v16, 0.0  ;;  %v1394_v60 = vsel %vm1099_vm3, %v1283_v27, 0.0 }
 0x136   :  { %v741_v37 = vpack.c.bf16 %v2500_v0, %v2461_v46  ;;  %v1087_v39 = vunpack.c.l.bf16 %v740_v10  ;;  %v1608_v62 = vpack.c.bf16 %v2591_v3, %v2591_v3  ;;  %v1199_v4 = vsel %vm1099_vm3, %v1085_v26, 0.0  ;;  %v1711_v0 = vpop.f32.mrf.mxu1 }
 0x137   :  { %v1391_v32 = vadd.f32 %v1390_v24, %v1389_v21  ;;  %v1194_v34 = vadd.f32 %v1193_v13, %v1192_v48  ;;  %v1286_v51 = vmul.f32 %v1086_v45, %v1086_v45  ;;  %v1201_v41 = vsel %vm1099_vm3, %v1086_v45, 0.0 }
 0x138   :  { %v1396_v12 = vsel %vm1099_vm3, %v1284_v36, 0.0  ;;  %v1088_v35 = vunpack.c.h.bf16 %v740_v10  ;;  %1030 = vst.msk [vmem:[%s2734_s4 + $0xec] sm:$0xf] %vm970_vm2, %v1608_v62  ;;  %v1606_v46 = vpack.c.bf16 %v2611_v54, %v2611_v54  ;;  %v1611_v28 = vpack.c.bf16 %v2632_v22, %v2632_v22  ;;  %v702_v56 = vpop.f32.mrf.mxu1 }
 0x139   :  { %v1196_v59 = vadd.f32 %v1195_v20, %v1194_v34  ;;  %v1393_v42 = vadd.f32 %v1392_v29, %v1391_v32  ;;  %v1609_v50 = vpack.c.bf16 %v699_v17, %v699_v17  ;;  %v1398_v47 = vsel %vm1099_vm3, %v1285_v1, 0.0 }
 0x13a   :  { %v1089_v52 = vunpack.c.l.bf16 %v741_v37  ;;  %v1287_v25 = vmul.f32 %v1087_v39, %v1087_v39  ;;  %v742_v61 = vpack.c.bf16 %v2611_v54, %v2569_v18  ;;  %1028 = vst.msk [vmem:[%s2734_s4 + $0xe4] sm:$0xf] %vm970_vm2, %v1606_v46  ;;  %v1400_v49 = vsel %vm1099_vm3, %v1286_v51, 0.0  ;;  %1033 = vst.msk [vmem:[%s2734_s4 + $0xf8] sm:$0xf] %vm970_vm2, %v1611_v28 }
 0x13b   :  { %v1198_v2 = vadd.f32 %v1197_v33, %v1196_v59  ;;  %v1395_v19 = vadd.f32 %v1394_v60, %v1393_v42  ;;  %1031 = vst.msk [vmem:[%s2734_s4 + $0xf0] sm:$0xf] %vm970_vm2, %v1609_v50  ;;  %v1090_v18 = vunpack.c.h.bf16 %v741_v37  ;;  %v1203_v54 = vsel %vm1099_vm3, %v1087_v39, 0.0 }
 0x13c   :  { %v1288_v55 = vmul.f32 %v1088_v35, %v1088_v35  ;;  %v1612_v40 = vpack.c.bf16 %v1711_v0, %v1711_v0  ;;  %v743_v63 = vpack.c.bf16 %v2591_v3, %v2553_v11  ;;  %v1289_v6 = vmul.f32 %v1089_v52, %v1089_v52 }
 0x13d   :  { %v1200_v43 = vadd.f32 %v1199_v4, %v1198_v2  ;;  %v1397_v5 = vadd.f32 %v1396_v12, %v1395_v19  ;;  %v1205_v7 = vsel %vm1099_vm3, %v1088_v35, 0.0  ;;  %v1402_v13 = vsel %vm1099_vm3, %v1287_v25, 0.0 }
 0x13e   :  { %v1091_v38 = vunpack.c.l.bf16 %v742_v61  ;;  %1034 = vst.msk [vmem:[%s2734_s4 + $0xfc] sm:$0xf] %vm970_vm2, %v1612_v40  ;;  %v1610_v9 = vpack.c.bf16 %v702_v56, %v702_v56  ;;  %v1207_v15 = vsel %vm1099_vm3, %v1089_v52, 0.0  ;;  %v1290_v16 = vmul.f32 %v1090_v18, %v1090_v18 }
 0x13f   :  { %v1399_v44 = vadd.f32 %v1398_v47, %v1397_v5  ;;  %v1202_v53 = vadd.f32 %v1201_v41, %v1200_v43  ;;  %v1404_v8 = vsel %vm1099_vm3, %v1288_v55, 0.0  ;;  %v1092_v11 = vunpack.c.h.bf16 %v742_v61 }
 0x140   :  { %v1093_v48 = vunpack.c.l.bf16 %v743_v63  ;;  %1032 = vst.msk [vmem:[%s2734_s4 + $0xf4] sm:$0xf] %vm970_vm2, %v1610_v9  ;;  %v1209_v21 = vsel %vm1099_vm3, %v1090_v18, 0.0  ;;  %v1406_v26 = vsel %vm1099_vm3, %v1289_v6, 0.0  ;;  %v1291_v27 = vmul.f32 %v1091_v38, %v1091_v38  ;;  %s1739_s4 = smov [#allocation2]  }
 0x141   :  { %v1204_v57 = vadd.f32 %v1203_v54, %v1202_v53  ;;  %v1401_v58 = vadd.f32 %v1400_v49, %v1399_v44  ;;  %v744_v10 = vpack.c.bf16 %v702_v56, %v699_v17  ;;  %v1408_v32 = vsel %vm1099_vm3, %v1290_v16, 0.0  ;;  %s1441_s23 = sshll.u32 %s1739_s4, 4  ;;  %s1442_s23 = int_to_ptr.vmem [resolvable:$true] %s1441_s23 }
 0x142   :  { %v1094_v45 = vunpack.c.h.bf16 %v743_v63  ;;  %v1211_v34 = vsel %vm1099_vm3, %v1091_v38, 0.0  ;;  %v1292_v29 = vmul.f32 %v1092_v11, %v1092_v11  ;;  %v1293_v20 = vmul.f32 %v1093_v48, %v1093_v48  ;;  %s1717_s24 = scalar_lea.vmem %s1442_s23, 32  ;;  %p1722_p1 = scmp.lt.s32.totalorder %s1442_s23, %s1442_s23 }
 0x143   :  { %v1206_v23 = vadd.f32 %v1205_v7, %v1204_v57  ;;  %v1403_v31 = vadd.f32 %v1402_v13, %v1401_v58  ;;  %v1213_v59 = vsel %vm1099_vm3, %v1092_v11, 0.0  ;;  %v1410_v33 = vsel %vm1099_vm3, %v1291_v27, 0.0  ;;  %p1718_p0 = scmp.ne.s32.totalorder %s1442_s23, %s1717_s24  ;;  %p1723_p2 = scmp.lt.s32.totalorder %s1717_s24, %s1717_s24 }
 0x144   :  { %v745_v42 = vpack.c.bf16 %v1711_v0, %v2632_v22  ;;  %v1095_v60 = vunpack.c.l.bf16 %v744_v10  ;;  %v1215_v39 = vsel %vm1099_vm3, %v1093_v48, 0.0  ;;  %v1294_v62 = vmul.f32 %v1094_v45, %v1094_v45 }
 0x145   :  { %v1208_v3 = vadd.f32 %v1207_v15, %v1206_v23  ;;  %v1405_v24 = vadd.f32 %v1404_v8, %v1403_v31  ;;  %v1412_v4 = vsel %vm1099_vm3, %v1292_v29, 0.0  ;;  %v1096_v51 = vunpack.c.h.bf16 %v744_v10  ;;  %p1724_p3 = por %p1723_p2, %p1722_p1 }
 0x146   :  { %v1217_v41 = vsel %vm1099_vm3, %v1094_v45, 0.0  ;;  %v1414_v12 = vsel %vm1099_vm3, %v1293_v20, 0.0  ;;  %v1097_v35 = vunpack.c.l.bf16 %v745_v42  ;;  %v1295_v46 = vmul.f32 %v1095_v60, %v1095_v60 }
 0x147   :  { %v1407_v30 = vadd.f32 %v1406_v26, %v1405_v24  ;;  %v1210_v14 = vadd.f32 %v1209_v21, %v1208_v3  ;;  %v1416_v22 = vsel %vm1099_vm3, %v1294_v62, 0.0  ;;  %v1098_v0 = vunpack.c.h.bf16 %v745_v42  ;;  %p1725_p4 = pnand %p1724_p3, %p1718_p0 }
 0x148   :  { %v1219_v28 = vsel %vm1099_vm3, %v1095_v60, 0.0  ;;  %v1296_v50 = vmul.f32 %v1096_v51, %v1096_v51  ;;  %v1297_v25 = vmul.f32 %v1097_v35, %v1097_v35  ;;  %v1221_v61 = vsel %vm1099_vm3, %v1096_v51, 0.0 }
 0x149   :  { %v1212_v36 = vadd.f32 %v1211_v34, %v1210_v14  ;;  %v1409_v1 = vadd.f32 %v1408_v32, %v1407_v30  ;;  %v1418_v49 = vsel %vm1099_vm3, %v1295_v46, 0.0  ;;  %v1223_v18 = vsel %vm1099_vm3, %v1097_v35, 0.0 }
 0x14a   :  { %v1298_v54 = vmul.f32 %v1098_v0, %v1098_v0  ;;  %v1420_v55 = vsel %vm1099_vm3, %v1296_v50, 0.0  ;;  %v1225_v57 = vsel %vm1099_vm3, %v1098_v0, 0.0  ;;  %v1422_v58 = vsel %vm1099_vm3, %v1297_v25, 0.0 }
 0x14b   :  { %v1214_v37 = vadd.f32 %v1213_v59, %v1212_v36  ;;  %v1411_v17 = vadd.f32 %v1410_v33, %v1409_v1 }
 0x14c   :  { %v1424_v7 = vsel %vm1099_vm3, %v1298_v54, 0.0 }
 0x14d   :  { %v1216_v2 = vadd.f32 %v1215_v39, %v1214_v37  ;;  %v1413_v19 = vadd.f32 %v1412_v4, %v1411_v17 }
 0x14f   :  { %v1415_v43 = vadd.f32 %v1414_v12, %v1413_v19  ;;  %v1218_v5 = vadd.f32 %v1217_v41, %v1216_v2 }
 0x151   :  { %v1220_v47 = vadd.f32 %v1219_v28, %v1218_v5  ;;  %v1417_v52 = vadd.f32 %v1416_v22, %v1415_v43 }
 0x153   :  { %v1222_v44 = vadd.f32 %v1221_v61, %v1220_v47  ;;  %v1419_v53 = vadd.f32 %v1418_v49, %v1417_v52 }
 0x155   :  { %v1224_v40 = vadd.f32 %v1223_v18, %v1222_v44  ;;  %v1421_v56 = vadd.f32 %v1420_v55, %v1419_v53 }
 0x157   :  { %v1226_v63 = vadd.f32 %v1225_v57, %v1224_v40  ;;  %v1423_v6 = vadd.f32 %v1422_v58, %v1421_v56 }
 0x159   :  { %v1227_v13 = vrot.slane %v1226_v63, 4  ;;  %v1425_v38 = vadd.f32 %v1424_v7, %v1423_v6 }
 0x15b   :  { %v1228_v23 = vadd.f32 %v1227_v13, %v1226_v63  ;;  %v1426_v31 = vrot.slane %v1425_v38, 4 }
 0x15d   :  { %v1229_v9 = vrot.slane %v1228_v23, 2  ;;  %v1427_v15 = vadd.f32 %v1426_v31, %v1425_v38 }
 0x15f   :  { %v1230_v16 = vadd.f32 %v1229_v9, %v1228_v23  ;;  %v1428_v8 = vrot.slane %v1427_v15, 2 }
 0x161   :  { %v1231_v11 = vrot.slane %v1230_v16, 1  ;;  %v1429_v3 = vadd.f32 %v1428_v8, %v1427_v15 }
 0x163   :  { %v1232_v24 = vadd.f32 %v1231_v11, %v1230_v16  ;;  %v1430_v48 = vrot.slane %v1429_v3, 1 }
 0x165   :  { %1234 = vst.msk [vmem:[#allocation2] sm:$0x1] %vm1233_vm4, %v1232_v24  ;;  %v1431_v21 = vadd.f32 %v1430_v48, %v1429_v3 }
 0x167   :  { %1432 = vst.msk [vmem:[#allocation2 + $0x1] sm:$0x1] %vm1233_vm4, %v1431_v21 }
 0x168   :  { %1728 = shalt.err (!%p1725_p4)
}
 0x169   :  { %1444 = dma.vmem_to_hbm [thread:$0]  %s1442_s23, 32, %s2735_s5, [#allocation3]  }
 0x16a   :  { %1737 = dma.done.wait [#allocation3], 32  }
 0x16b   :  { %1738 = vsyncadd [#allocation3], 4294967264 }
 0x16c   :  { %1450 = vsyncpa [#allocation3], 1 }

</bundles_post_ra>
